<compile_context>
chip_gen: v5e
topology: v5e:2x2
jax: 0.10.0
libtpu: 0.0.40
codegen_flags: <defaults>
</compile_context>

<pallas_src>
import functools

import jax
import jax.numpy as jnp
import numpy as np
from jax.experimental import pallas as pl
from jax.experimental.pallas import tpu as pltpu


def _round_up(x, m):
    return ((x + m - 1) // m) * m


def _triplet_kernel(x_ref, sq_ref, tcol_ref, trow_ref, o_ref, *, n_actual, tm):
    i = pl.program_id(0)
    n_pad = x_ref.shape[0]

    row0 = pl.multiple_of(i * tm, tm)
    x_tile = x_ref[pl.ds(row0, tm), :]                          # (tm, d_pad)
    t_tile = tcol_ref[pl.ds(row0, tm), :]                       # (tm, 1)

    # Squared pairwise distances of this row strip against all columns.
    # Gram = x_tile . x^T via dot_general contracting the feature dim of both
    # operands (no transposed copy of x is ever materialized).
    sq_t = jnp.sum(x_tile * x_tile, axis=1, keepdims=True)      # (tm, 1)
    gram = jax.lax.dot_general(
        x_tile, x_ref[...],
        dimension_numbers=(((1,), (1,)), ((), ())),
        preferred_element_type=jnp.float32)                     # (tm, n_pad)
    d2 = jnp.maximum(sq_t + sq_ref[...] - 2.0 * gram,
                     jnp.float32(1e-12))                        # (tm, n_pad)

    same = t_tile == trow_ref[...]                              # (tm, n_pad)
    col = jax.lax.broadcasted_iota(jnp.int32, (tm, n_pad), 1)
    if n_pad != n_actual:
        valid = col < n_actual
        pos_mask = jnp.logical_and(same, valid)
        neg_mask = jnp.logical_and(jnp.logical_not(same), valid)
    else:
        pos_mask = same
        neg_mask = jnp.logical_not(same)

    pos = jnp.where(pos_mask, d2, jnp.float32(-jnp.inf))
    neg = jnp.where(neg_mask, d2, jnp.float32(jnp.inf))

    # Search on clamped d^2 (sqrt is monotone -> same hardest pos/neg).
    ap2 = jnp.max(pos, axis=1, keepdims=True)                   # (tm, 1)
    an2 = jnp.min(neg, axis=1, keepdims=True)                   # (tm, 1)

    # PyTorch reference keeps the LAST index on ties -> max matching index.
    # (-inf / +inf fill never equals a finite row extremum, so the class mask
    #  is implied by the equality.)
    j_ap = jnp.max(jnp.where(pos == ap2, col, -1), axis=1, keepdims=True)
    j_an = jnp.max(jnp.where(neg == an2, col, -1), axis=1, keepdims=True)

    # dist_an2[i] = dist[j_ap[i], j_an[i]]: gather both feature rows with ONE
    # fused (2*tm, n_pad) @ (n_pad, d_pad) one-hot matmul (single weight push).
    oh = jnp.concatenate(
        [(col == j_ap).astype(jnp.float32),
         (col == j_an).astype(jnp.float32)], axis=0)            # (2*tm, n_pad)
    xab = jnp.dot(oh, x_ref[...], preferred_element_type=jnp.float32)
    xa = xab[:tm, :]                                            # x[j_ap]
    xb = xab[tm:, :]                                            # x[j_an]
    sq_a = jnp.sum(xa * xa, axis=1, keepdims=True)
    sq_b = jnp.sum(xb * xb, axis=1, keepdims=True)
    ab = jnp.sum(xa * xb, axis=1, keepdims=True)
    d2_an2 = jnp.maximum(sq_a + sq_b - 2.0 * ab, jnp.float32(1e-12))

    # sqrt only on the three (tm, 1) per-row results (EUP, O(tm) per strip).
    dist_ap = jnp.sqrt(ap2)
    dist_an = jnp.sqrt(an2)
    dist_an2 = jnp.sqrt(d2_an2)

    # MarginRankingLoss(margin=0, y=1, reduce=False): max(0, d_ap - d_an).
    loss = jnp.maximum(dist_ap - dist_an, 0.0)                  # (tm, 1)
    loss3 = jnp.abs(dist_an - dist_an2)                         # (tm, 1)
    # (loss2 in the PyTorch code is computed but never used -> omitted.)

    if n_pad != n_actual:
        rows = jax.lax.broadcasted_iota(jnp.int32, (tm, 1), 0) + row0
        row_valid = rows < n_actual
        loss = jnp.where(row_valid, loss, 0.0)
        loss3 = jnp.where(row_valid, loss3, 0.0)

    o_ref[:, 0:1] = loss
    o_ref[:, 1:2] = loss3


def reference_loss(inputs, targets, tm=256, vmem_limit_bytes=None):
    """inputs: (n, d) float32, targets: (n,) int -> (loss_final, l1, l2)."""
    n, d = inputs.shape
    x = inputs.astype(jnp.float32)
    t = targets.astype(jnp.int32)

    # Lane-aligned padding: rows to a multiple of tm (itself a multiple of
    # 128), features zero-padded to a multiple of 128 (exact for norms/dots).
    tm = max(128, _round_up(tm, 128))
    tm = min(tm, _round_up(n, 128))
    n_pad = _round_up(n, tm)
    d_pad = _round_up(d, 128)
    if (n_pad, d_pad) != (n, d):
        x = jnp.pad(x, ((0, n_pad - n), (0, d_pad - d)))
    if n_pad != n:
        t = jnp.pad(t, (0, n_pad - n))

    sq_row = jnp.sum(x * x, axis=1).reshape(1, n_pad)  # hoisted column norms
    t_col = t.reshape(n_pad, 1)
    t_row = t.reshape(1, n_pad)

    if vmem_limit_bytes is None:
        resident = 4 * (n_pad * d_pad + 3 * n_pad)
        per_strip = 4 * (12 * tm * n_pad + 4 * tm * d_pad)
        vmem_limit_bytes = min(64 * 1024 * 1024,
                               max(32 * 1024 * 1024,
                                   resident + per_strip + (1 << 20)))

    kernel = functools.partial(_triplet_kernel, n_actual=n, tm=tm)
    out = pl.pallas_call(
        kernel,
        out_shape=jax.ShapeDtypeStruct((n_pad, 2), jnp.float32),
        grid=(n_pad // tm,),
        in_specs=[
            pl.BlockSpec(memory_space=pltpu.MemorySpace.VMEM),  # x (resident)
            pl.BlockSpec(memory_space=pltpu.MemorySpace.VMEM),  # col sq norms
            pl.BlockSpec(memory_space=pltpu.MemorySpace.VMEM),  # targets (n,1)
            pl.BlockSpec(memory_space=pltpu.MemorySpace.VMEM),  # targets (1,n)
        ],
        out_specs=pl.BlockSpec((tm, 2), lambda i: (i, 0)),
        compiler_params=pltpu.CompilerParams(
            dimension_semantics=("parallel",),
            vmem_limit_bytes=vmem_limit_bytes,
        ),
        cost_estimate=pl.CostEstimate(
            flops=6 * n_pad * n_pad * d_pad,
            transcendentals=3 * n_pad,
            bytes_accessed=4 * (n_pad * d_pad + 5 * n_pad),
        ),
    )(x, sq_row, t_col, t_row)

    sums = jnp.sum(out, axis=0)          # padded rows are zeroed in-kernel
    inv_n = jnp.float32(1.0 / n)
    l1 = sums[0] * inv_n                 # mean(loss)
    l2 = sums[1] * inv_n                 # mean(loss3)
    return l1 + l2, l1, l2               # loss_final, l1, l2


def _reference_jax(inputs, targets):
    """Pure-JAX replica of the PyTorch forward, for verification."""
    n = inputs.shape[0]
    sq = jnp.sum(inputs * inputs, axis=1, keepdims=True)
    dist = sq + sq.T - 2.0 * (inputs @ inputs.T)
    dist = jnp.sqrt(jnp.clip(dist, 1e-12))
    mask = targets[:, None] == targets[None, :]
    dist_ap = jnp.max(jnp.where(mask, dist, -jnp.inf), axis=1)
    dist_an = jnp.min(jnp.where(~mask, dist, jnp.inf), axis=1)
    col = jnp.arange(n)
    j_ap = jnp.max(jnp.where(mask & (dist == dist_ap[:, None]), col, -1), axis=1)
    j_an = jnp.max(jnp.where((~mask) & (dist == dist_an[:, None]), col, -1), axis=1)
    dist_an2 = dist[j_ap, j_an]
    loss = jnp.maximum(dist_ap - dist_an, 0.0)
    loss3 = jnp.abs(dist_an - dist_an2)
    return jnp.mean(loss + loss3), jnp.mean(loss), jnp.mean(loss3)


if __name__ == "__main__":
    key = jax.random.PRNGKey(0)

    # Case 1: single strip, both n and d unaligned -> exercises the row /
    # column padding masks and the zero-padded feature dimension.
    n1, d1 = 24, 32
    x1 = jax.random.normal(key, (n1, d1), dtype=jnp.float32)
    t1 = jnp.arange(n1, dtype=jnp.int32) // 4          # 6 classes of 4
    got1 = jax.block_until_ready(reference_loss(x1, t1))
    exp1 = _reference_jax(x1, t1)
    assert np.allclose(np.array(got1), np.array(exp1), rtol=1e-3, atol=1e-3), (
        np.array(got1), np.array(exp1))

    # Case 2: multi-strip parallel grid (tm=128 -> 2 strips) plus padding.
    n2, d2 = 200, 48
    x2 = jax.random.normal(jax.random.fold_in(key, 1), (n2, d2), dtype=jnp.float32)
    t2 = jnp.arange(n2, dtype=jnp.int32) // 5           # 40 classes of 5
    got2 = jax.block_until_ready(reference_loss(x2, t2, tm=128))
    exp2 = _reference_jax(x2, t2)
    assert np.allclose(np.array(got2), np.array(exp2), rtol=1e-3, atol=1e-3), (
        np.array(got2), np.array(exp2))

    print("KERNEL_OK")
</pallas_src>

<mosaic_0001>
module attributes {stable_mosaic.version = 11 : i64} {
  func.func @_triplet_kernel(%arg0: i32, %arg1: memref<128x128xf32, #tpu.memory_space<vmem>>, %arg2: memref<1x128xf32, #tpu.memory_space<vmem>>, %arg3: memref<128x1xi32, #tpu.memory_space<vmem>>, %arg4: memref<1x128xi32, #tpu.memory_space<vmem>>, %arg5: memref<128x2xf32, #tpu.memory_space<vmem>>) attributes {dimension_semantics = [#tpu.dimension_semantics<parallel>], iteration_bounds = array<i64: 1>, scalar_prefetch = 0 : i64, scratch_operands = 0 : i64, tpu.core_type = #tpu.core_type<tc>, window_params = [{pipeline_mode = #tpu.pipeline_mode<synchronous>, transform_indices = @transform_0, window_bounds = array<i64: 128, 128>}, {pipeline_mode = #tpu.pipeline_mode<synchronous>, transform_indices = @transform_1, window_bounds = array<i64: 1, 128>}, {pipeline_mode = #tpu.pipeline_mode<synchronous>, transform_indices = @transform_2, window_bounds = array<i64: 128, 1>}, {pipeline_mode = #tpu.pipeline_mode<synchronous>, transform_indices = @transform_3, window_bounds = array<i64: 1, 128>}, {transform_indices = @transform_4, window_bounds = array<i64: 128, 2>}]} {
    %c128_i32 = arith.constant 128 : i32
    %0 = arith.muli %arg0, %c128_i32 : i32
    %1 = tpu.assume_multiple %0, 128 : i32
    %2 = arith.index_cast %1 : i32 to index
    %c0 = arith.constant 0 : index
    %3 = vector.load %arg1[%2, %c0] : memref<128x128xf32, #tpu.memory_space<vmem>>, vector<128x128xf32>
    %4 = arith.index_cast %1 : i32 to index
    %c0_0 = arith.constant 0 : index
    %5 = vector.load %arg3[%4, %c0_0] : memref<128x1xi32, #tpu.memory_space<vmem>>, vector<128x1xi32>
    %6 = arith.mulf %3, %3 : vector<128x128xf32>
    %cst = arith.constant dense<0.000000e+00> : vector<128xf32>
    %7 = vector.multi_reduction <add>, %6, %cst [1] : vector<128x128xf32> to vector<128xf32>
    %8 = vector.shape_cast %7 : vector<128xf32> to vector<128x1xf32>
    %c0_1 = arith.constant 0 : index
    %c0_2 = arith.constant 0 : index
    %9 = vector.load %arg1[%c0_1, %c0_2] : memref<128x128xf32, #tpu.memory_space<vmem>>, vector<128x128xf32>
    %cst_3 = arith.constant dense<0.000000e+00> : vector<128x128xf32>
    %10 = tpu.matmul %3, %9, %cst_3 {dimension_numbers = #tpu.dot_dimension_numbers<[1], [1], [0], [0], [0, 0, 1, 0], [], []>} : vector<128x128xf32>, vector<128x128xf32>, vector<128x128xf32> -> vector<128x128xf32>
    %c0_4 = arith.constant 0 : index
    %c0_5 = arith.constant 0 : index
    %11 = vector.load %arg2[%c0_4, %c0_5] : memref<1x128xf32, #tpu.memory_space<vmem>>, vector<1x128xf32>
    %12 = vector.broadcast %8 : vector<128x1xf32> to vector<128x128xf32>
    %13 = vector.broadcast %11 : vector<1x128xf32> to vector<128x128xf32>
    %14 = arith.addf %12, %13 : vector<128x128xf32>
    %cst_6 = arith.constant 2.000000e+00 : f32
    %15 = vector.broadcast %cst_6 : f32 to vector<128x128xf32>
    %16 = arith.mulf %15, %10 : vector<128x128xf32>
    %17 = arith.subf %14, %16 : vector<128x128xf32>
    %cst_7 = arith.constant 9.99999996E-13 : f32
    %18 = vector.broadcast %cst_7 : f32 to vector<128x128xf32>
    %19 = arith.maximumf %17, %18 : vector<128x128xf32>
    %c0_8 = arith.constant 0 : index
    %c0_9 = arith.constant 0 : index
    %20 = vector.load %arg4[%c0_8, %c0_9] : memref<1x128xi32, #tpu.memory_space<vmem>>, vector<1x128xi32>
    %21 = vector.broadcast %5 : vector<128x1xi32> to vector<128x128xi32>
    %22 = vector.broadcast %20 : vector<1x128xi32> to vector<128x128xi32>
    %23 = arith.cmpi eq, %21, %22 : vector<128x128xi32>
    %24 = tpu.iota {dimensions = array<i32: 1>} : vector<128x128xi32>
    %c24_i32 = arith.constant 24 : i32
    %25 = vector.broadcast %c24_i32 : i32 to vector<128x128xi32>
    %26 = arith.cmpi slt, %24, %25 : vector<128x128xi32>
    %27 = arith.andi %23, %26 : vector<128x128xi1>
    %cst_10 = arith.constant dense<true> : vector<128x128xi1>
    %28 = arith.xori %23, %cst_10 : vector<128x128xi1>
    %29 = arith.andi %28, %26 : vector<128x128xi1>
    %cst_11 = arith.constant 0xFF800000 : f32
    %30 = vector.broadcast %cst_11 : f32 to vector<128x128xf32>
    %31 = arith.select %27, %19, %30 : vector<128x128xi1>, vector<128x128xf32>
    %cst_12 = arith.constant 0x7F800000 : f32
    %32 = vector.broadcast %cst_12 : f32 to vector<128x128xf32>
    %33 = arith.select %29, %19, %32 : vector<128x128xi1>, vector<128x128xf32>
    %cst_13 = arith.constant dense<0xFF800000> : vector<128xf32>
    %34 = vector.multi_reduction <maximumf>, %31, %cst_13 [1] : vector<128x128xf32> to vector<128xf32>
    %35 = vector.shape_cast %34 : vector<128xf32> to vector<128x1xf32>
    %cst_14 = arith.constant dense<0x7F800000> : vector<128xf32>
    %36 = vector.multi_reduction <minimumf>, %33, %cst_14 [1] : vector<128x128xf32> to vector<128xf32>
    %37 = vector.shape_cast %36 : vector<128xf32> to vector<128x1xf32>
    %38 = vector.broadcast %35 : vector<128x1xf32> to vector<128x128xf32>
    %39 = arith.cmpf oeq, %31, %38 : vector<128x128xf32>
    %c-1_i32 = arith.constant -1 : i32
    %40 = vector.broadcast %c-1_i32 : i32 to vector<128x128xi32>
    %41 = arith.select %39, %24, %40 : vector<128x128xi1>, vector<128x128xi32>
    %cst_15 = arith.constant dense<-2147483648> : vector<128xi32>
    %42 = vector.multi_reduction <maxsi>, %41, %cst_15 [1] : vector<128x128xi32> to vector<128xi32>
    %43 = vector.shape_cast %42 : vector<128xi32> to vector<128x1xi32>
    %44 = vector.broadcast %37 : vector<128x1xf32> to vector<128x128xf32>
    %45 = arith.cmpf oeq, %33, %44 : vector<128x128xf32>
    %c-1_i32_16 = arith.constant -1 : i32
    %46 = vector.broadcast %c-1_i32_16 : i32 to vector<128x128xi32>
    %47 = arith.select %45, %24, %46 : vector<128x128xi1>, vector<128x128xi32>
    %cst_17 = arith.constant dense<-2147483648> : vector<128xi32>
    %48 = vector.multi_reduction <maxsi>, %47, %cst_17 [1] : vector<128x128xi32> to vector<128xi32>
    %49 = vector.shape_cast %48 : vector<128xi32> to vector<128x1xi32>
    %50 = vector.broadcast %43 : vector<128x1xi32> to vector<128x128xi32>
    %51 = arith.cmpi eq, %24, %50 : vector<128x128xi32>
    %52 = arith.extui %51 : vector<128x128xi1> to vector<128x128xi32>
    %53 = arith.sitofp %52 : vector<128x128xi32> to vector<128x128xf32>
    %54 = vector.broadcast %49 : vector<128x1xi32> to vector<128x128xi32>
    %55 = arith.cmpi eq, %24, %54 : vector<128x128xi32>
    %56 = arith.extui %55 : vector<128x128xi1> to vector<128x128xi32>
    %57 = arith.sitofp %56 : vector<128x128xi32> to vector<128x128xf32>
    %58 = tpu.concatenate %53, %57 in 0 : vector<128x128xf32>, vector<128x128xf32> -> vector<256x128xf32>
    %c0_18 = arith.constant 0 : index
    %c0_19 = arith.constant 0 : index
    %59 = vector.load %arg1[%c0_18, %c0_19] : memref<128x128xf32, #tpu.memory_space<vmem>>, vector<128x128xf32>
    %cst_20 = arith.constant dense<0.000000e+00> : vector<256x128xf32>
    %60 = tpu.matmul %58, %59, %cst_20 {dimension_numbers = #tpu.dot_dimension_numbers<[1], [0], [0], [1], [0, 0, 1, 1], [], []>} : vector<256x128xf32>, vector<128x128xf32>, vector<256x128xf32> -> vector<256x128xf32>
    %61 = vector.extract_strided_slice %60 {offsets = [0, 0], sizes = [128, 128], strides = [1, 1]} : vector<256x128xf32> to vector<128x128xf32>
    %62 = vector.extract_strided_slice %60 {offsets = [128, 0], sizes = [128, 128], strides = [1, 1]} : vector<256x128xf32> to vector<128x128xf32>
    %63 = arith.mulf %61, %61 : vector<128x128xf32>
    %cst_21 = arith.constant dense<0.000000e+00> : vector<128xf32>
    %64 = vector.multi_reduction <add>, %63, %cst_21 [1] : vector<128x128xf32> to vector<128xf32>
    %65 = vector.shape_cast %64 : vector<128xf32> to vector<128x1xf32>
    %66 = arith.mulf %62, %62 : vector<128x128xf32>
    %cst_22 = arith.constant dense<0.000000e+00> : vector<128xf32>
    %67 = vector.multi_reduction <add>, %66, %cst_22 [1] : vector<128x128xf32> to vector<128xf32>
    %68 = vector.shape_cast %67 : vector<128xf32> to vector<128x1xf32>
    %69 = arith.mulf %61, %62 : vector<128x128xf32>
    %cst_23 = arith.constant dense<0.000000e+00> : vector<128xf32>
    %70 = vector.multi_reduction <add>, %69, %cst_23 [1] : vector<128x128xf32> to vector<128xf32>
    %71 = vector.shape_cast %70 : vector<128xf32> to vector<128x1xf32>
    %72 = arith.addf %65, %68 : vector<128x1xf32>
    %cst_24 = arith.constant 2.000000e+00 : f32
    %73 = vector.broadcast %cst_24 : f32 to vector<128x1xf32>
    %74 = arith.mulf %73, %71 : vector<128x1xf32>
    %75 = arith.subf %72, %74 : vector<128x1xf32>
    %cst_25 = arith.constant 9.99999996E-13 : f32
    %76 = vector.broadcast %cst_25 : f32 to vector<128x1xf32>
    %77 = arith.maximumf %75, %76 : vector<128x1xf32>
    %78 = math.sqrt %35 : vector<128x1xf32>
    %79 = math.sqrt %37 : vector<128x1xf32>
    %80 = math.sqrt %77 : vector<128x1xf32>
    %81 = arith.subf %78, %79 : vector<128x1xf32>
    %cst_26 = arith.constant 0.000000e+00 : f32
    %82 = vector.broadcast %cst_26 : f32 to vector<128x1xf32>
    %83 = arith.maximumf %81, %82 : vector<128x1xf32>
    %84 = arith.subf %79, %80 : vector<128x1xf32>
    %85 = math.absf %84 : vector<128x1xf32>
    %86 = tpu.iota {dimensions = array<i32: 0>} : vector<128x1xi32>
    %87 = vector.broadcast %1 : i32 to vector<128x1xi32>
    %88 = arith.addi %86, %87 : vector<128x1xi32>
    %c24_i32_27 = arith.constant 24 : i32
    %89 = vector.broadcast %c24_i32_27 : i32 to vector<128x1xi32>
    %90 = arith.cmpi slt, %88, %89 : vector<128x1xi32>
    %cst_28 = arith.constant 0.000000e+00 : f32
    %91 = vector.broadcast %cst_28 : f32 to vector<128x1xf32>
    %92 = arith.select %90, %83, %91 : vector<128x1xi1>, vector<128x1xf32>
    %cst_29 = arith.constant 0.000000e+00 : f32
    %93 = vector.broadcast %cst_29 : f32 to vector<128x1xf32>
    %94 = arith.select %90, %85, %93 : vector<128x1xi1>, vector<128x1xf32>
    %c0_30 = arith.constant 0 : index
    %c0_31 = arith.constant 0 : index
    %95 = vector.load %arg5[%c0_30, %c0_31] : memref<128x2xf32, #tpu.memory_space<vmem>>, vector<128x1xf32>
    tpu.vector_store %arg5[%c0_30, %c0_31], %92 {strides = array<i32>} : memref<128x2xf32, #tpu.memory_space<vmem>>, vector<128x1xf32>,
    %c0_32 = arith.constant 0 : index
    %c1 = arith.constant 1 : index
    %96 = vector.load %arg5[%c0_32, %c1] : memref<128x2xf32, #tpu.memory_space<vmem>>, vector<128x1xf32>
    tpu.vector_store %arg5[%c0_32, %c1], %94 {strides = array<i32>} : memref<128x2xf32, #tpu.memory_space<vmem>>, vector<128x1xf32>,
    return
  }
  func.func @transform_0(%arg0: i32) -> (i32, i32) {
    %c0_i32 = arith.constant 0 : i32
    %c0_i32_0 = arith.constant 0 : i32
    %c0_i32_1 = arith.constant 0 : i32
    return %c0_i32, %c0_i32_0 : i32, i32
  }
  func.func @transform_1(%arg0: i32) -> (i32, i32) {
    %c0_i32 = arith.constant 0 : i32
    %c0_i32_0 = arith.constant 0 : i32
    %c0_i32_1 = arith.constant 0 : i32
    return %c0_i32, %c0_i32_0 : i32, i32
  }
  func.func @transform_2(%arg0: i32) -> (i32, i32) {
    %c0_i32 = arith.constant 0 : i32
    %c0_i32_0 = arith.constant 0 : i32
    %c0_i32_1 = arith.constant 0 : i32
    return %c0_i32, %c0_i32_0 : i32, i32
  }
  func.func @transform_3(%arg0: i32) -> (i32, i32) {
    %c0_i32 = arith.constant 0 : i32
    %c0_i32_0 = arith.constant 0 : i32
    %c0_i32_1 = arith.constant 0 : i32
    return %c0_i32, %c0_i32_0 : i32, i32
  }
  func.func @transform_4(%arg0: i32) -> (i32, i32) {
    %c0_i32 = arith.constant 0 : i32
    %c0_i32_0 = arith.constant 0 : i32
    return %arg0, %c0_i32 : i32, i32
  }
}

</mosaic_0001>

<bundles_post_ra>
// kernel: tpu_custom_call.1
= control target key start
LH: loop header
LB: loop body
LE: loop exit
PB: predicated region body
PF: predicated region fallthrough
CT: control target
= control target key end

     0   :  { %9 = vsyncpa [#allocation3], 0  ;;  %s2332_s18 = smov [#allocation2]   ;;  %s3884_s0 = inlined_call_operand.vmem [shape: f32[128,128], index: 0, kind: input, shape index: {}]   ;;  %s3885_s1 = inlined_call_operand.vmem [shape: f32[1,128], index: 1, kind: input, shape index: {}]   ;;  %s3886_s2 = inlined_call_operand.vmem [shape: s32[128,1], index: 2, kind: input, shape index: {}]   ;;  %s3887_s3 = inlined_call_operand.hbm [shape: s32[1,128], index: 3, kind: input, shape index: {}]   ;;  %s3888_s4 = inlined_call_operand.vmem [shape: f32[128,2], index: 4, kind: output, shape index: {}]  }
   0x1   :  { %s21_s17 = sshll.u32 %s3887_s3, 4  ;;  %s23_s19 = sshll.u32 %s2332_s18, 4  ;;  %s22_s17 = int_to_ptr.hbm [resolvable:$true] %s21_s17  ;;  %s24_s19 = int_to_ptr.vmem [resolvable:$true] %s23_s19 }
   0x2   :  { %26 = dma.hbm_to_vmem [thread:$0]  %s22_s17, 16, %s24_s19, [#allocation3]  }
   0x3   :  { %2330 = dma.done.wait [#allocation3], 16  }
   0x4   :  { %2331 = vsyncadd [#allocation3], 4294967280  ;;  %v2368_v0 = vld [vmem:[%s3884_s0 + $0x78] sm:$0xff]  ;;  %v2373_v1 = vld [vmem:[%s3884_s0 + $0x10] sm:$0xff]  ;;  %v2333_v28 = vmov 0   ;;  %vm3893_vm1 = vmmov 1  }
   0x5   :  { %130 = vmatpush.xpose.msra.mxu0 %v2368_v0  ;;  %2230 = vmatpush.xpose.msra.mxu3 %v2368_v0  ;;  %v68_v2 = vmul.f32 %v2373_v1, %v2373_v1  ;;  %v2382_v3 = vld [vmem:[%s3884_s0 + $0x20] sm:$0xff]  ;;  %v2392_v5 = vld [vmem:[%s3884_s0 + $0x70] sm:$0xff]  ;;  %v2403_v8 = vld [vmem:[%s3884_s0 + $0x18] sm:$0xff]  ;;  %v81_v32 = vmul.f32 %v2368_v0, %v2368_v0 }
   0x6   :  { %v2387_v4 = vld [vmem:[%s3884_s0] sm:$0xff]  ;;  %v70_v6 = vmul.f32 %v2382_v3, %v2382_v3  ;;  %1084 = vmatpush.msra.mxu1 %v2368_v0  ;;  %2246 = vmatpush.msra.mxu2 %v2368_v0  ;;  %v2408_v9 = vld [vmem:[%s3884_s0 + $0x28] sm:$0xff]  ;;  %v69_v12 = vmul.f32 %v2403_v8, %v2403_v8  ;;  %v2444_v16 = vld [vmem:[%s3884_s0 + $0x38] sm:$0xff]  ;;  %v80_v30 = vmul.f32 %v2392_v5, %v2392_v5 }
   0x7   :  { %v66_v7 = vmul.f32 %v2387_v4, %v2387_v4  ;;  %86 = vadd.xlane.f32.xlu1 %v68_v2  ;;  %v2415_v10 = vld [vmem:[%s3884_s0 + $0x8] sm:$0xff]  ;;  %v71_v13 = vmul.f32 %v2408_v9, %v2408_v9  ;;  %v2437_v15 = vld [vmem:[%s3884_s0 + $0x60] sm:$0xff]  ;;  %v2451_v17 = vld [vmem:[%s3884_s0 + $0x58] sm:$0xff]  ;;  %v73_v20 = vmul.f32 %v2444_v16, %v2444_v16  ;;  %2285 = vset.pattern.permute.xlu0 %v2333_v28 }
   0x8   :  { %90 = vadd.xlane.f32.xlu2 %v70_v6  ;;  %v2420_v11 = vld [vmem:[%s3884_s0 + $0x68] sm:$0xff]  ;;  %1085 = vmatpush.msra.mxu1 %v2392_v5  ;;  %v67_v14 = vmul.f32 %v2415_v10, %v2415_v10  ;;  %v2456_v18 = vld [vmem:[%s3884_s0 + $0x40] sm:$0xff]  ;;  %v2461_v19 = vld [vmem:[%s3884_s0 + $0x30] sm:$0xff]  ;;  %v77_v26 = vmul.f32 %v2451_v17, %v2451_v17  ;;  %v78_v31 = vmul.f32 %v2437_v15, %v2437_v15 }
   0x9   :  { %82 = vadd.xlane.f32.xlu0 %v66_v7  ;;  %131 = vmatpush.xpose.msra.mxu0 %v2392_v5  ;;  %v2470_v21 = vld [vmem:[%s3884_s0 + $0x50] sm:$0xff]  ;;  %v74_v22 = vmul.f32 %v2456_v18, %v2456_v18  ;;  %v72_v23 = vmul.f32 %v2461_v19, %v2461_v19  ;;  %v2483_v24 = vld [vmem:[%s3884_s0 + $0x48] sm:$0xff]  ;;  %v79_v29 = vmul.f32 %v2420_v11, %v2420_v11  ;;  %v50_v33 = vld [vmem:[%s3886_s2] sm:$0xff] }
   0xa   :  { %2231 = vmatpush.xpose.msra.mxu3 %v2392_v5  ;;  %2248 = vmatpush.msra.mxu2 %v2392_v5  ;;  %v76_v25 = vmul.f32 %v2470_v21, %v2470_v21  ;;  %v75_v27 = vmul.f32 %v2483_v24, %v2483_v24  ;;  %v51_v34 = vld [vmem:[%s3886_s2 + $0x8] sm:$0xff]  ;;  %v64_v35 = vld [vmem:[%s3886_s2 + $0x70] sm:$0xff]  ;;  %v65_v37 = vld [vmem:[%s3886_s2 + $0x78] sm:$0xff] }
   0xb   :  { %1086 = vmatpush.msra.mxu1 %v2420_v11  ;;  %2283 = vset.pattern.permute.xlu1 %v2333_v28  ;;  %v52_v36 = vld [vmem:[%s3886_s2 + $0x10] sm:$0xff]  ;;  %v62_v38 = vld [vmem:[%s3886_s2 + $0x60] sm:$0xff]  ;;  %v53_v40 = vld [vmem:[%s3886_s2 + $0x18] sm:$0xff] }
   0xc   :  { %2250 = vmatpush.msra.mxu2 %v2420_v11  ;;  %2284 = vset.pattern.permute.xlu2 %v2333_v28  ;;  %v54_v39 = vld [vmem:[%s3886_s2 + $0x20] sm:$0xff]  ;;  %v60_v41 = vld [vmem:[%s3886_s2 + $0x50] sm:$0xff]  ;;  %v55_v43 = vld [vmem:[%s3886_s2 + $0x28] sm:$0xff] }
   0xd   :  { %132 = vmatpush.xpose.msra.mxu0 %v2420_v11  ;;  %1087 = vmatpush.msra.mxu1 %v2437_v15  ;;  %v56_v42 = vld [vmem:[%s3886_s2 + $0x30] sm:$0xff]  ;;  %v57_v44 = vld [vmem:[%s3886_s2 + $0x38] sm:$0xff]  ;;  %v58_v45 = vld [vmem:[%s3886_s2 + $0x40] sm:$0xff] }
   0xe   :  { %2232 = vmatpush.xpose.msra.mxu3 %v2420_v11  ;;  %2252 = vmatpush.msra.mxu2 %v2437_v15  ;;  %v59_v46 = vld [vmem:[%s3886_s2 + $0x48] sm:$0xff]  ;;  %v61_v47 = vld [vmem:[%s3886_s2 + $0x58] sm:$0xff]  ;;  %v2631_v55 = vld [vmem:[%s3885_s1] ss:$0 sm:$0xff] }
   0xf   :  { %88 = vadd.xlane.f32.xlu1 %v69_v12  ;;  %1088 = vmatpush.msra.mxu1 %v2451_v17  ;;  %v63_v48 = vld [vmem:[%s3886_s2 + $0x68] sm:$0xff] }
  0x10   :  { %92 = vadd.xlane.f32.xlu2 %v71_v13  ;;  %2254 = vmatpush.msra.mxu2 %v2451_v17 }
  0x11   :  { %84 = vadd.xlane.f32.xlu0 %v67_v14  ;;  %133 = vmatpush.xpose.msra.mxu0 %v2437_v15 }
  0x12   :  { %2233 = vmatpush.xpose.msra.mxu3 %v2437_v15  ;;  %1089 = vmatpush.msra.mxu1 %v2470_v21 }
  0x13   :  { %2256 = vmatpush.msra.mxu2 %v2470_v21 }
  0x14   :  { %1090 = vmatpush.msra.mxu1 %v2483_v24 }
  0x15   :  { %134 = vmatpush.xpose.msra.mxu0 %v2451_v17  ;;  %2258 = vmatpush.msra.mxu2 %v2483_v24 }
  0x16   :  { %2234 = vmatpush.xpose.msra.mxu3 %v2451_v17  ;;  %1091 = vmatpush.msra.mxu1 %v2456_v18 }
  0x17   :  { %96 = vadd.xlane.f32.xlu1 %v73_v20  ;;  %2260 = vmatpush.msra.mxu2 %v2456_v18 }
  0x18   :  { %98 = vadd.xlane.f32.xlu2 %v74_v22  ;;  %1092 = vmatpush.msra.mxu1 %v2444_v16 }
  0x19   :  { %94 = vadd.xlane.f32.xlu0 %v72_v23  ;;  %135 = vmatpush.xpose.msra.mxu0 %v2470_v21 }
  0x1a   :  { %2235 = vmatpush.xpose.msra.mxu3 %v2470_v21  ;;  %2262 = vmatpush.msra.mxu2 %v2444_v16 }
  0x1b   :  { %1093 = vmatpush.msra.mxu1 %v2461_v19 }
  0x1c   :  { %2264 = vmatpush.msra.mxu2 %v2461_v19 }
  0x1d   :  { %136 = vmatpush.xpose.msra.mxu0 %v2483_v24  ;;  %1094 = vmatpush.msra.mxu1 %v2408_v9 }
  0x1e   :  { %2236 = vmatpush.xpose.msra.mxu3 %v2483_v24  ;;  %2266 = vmatpush.msra.mxu2 %v2408_v9 }
  0x1f   :  { %102 = vadd.xlane.f32.xlu1 %v76_v25  ;;  %1095 = vmatpush.msra.mxu1 %v2382_v3 }
  0x20   :  { %104 = vadd.xlane.f32.xlu2 %v77_v26  ;;  %2268 = vmatpush.msra.mxu2 %v2382_v3 }
  0x21   :  { %100 = vadd.xlane.f32.xlu0 %v75_v27  ;;  %137 = vmatpush.xpose.msra.mxu0 %v2456_v18 }
  0x22   :  { %2237 = vmatpush.xpose.msra.mxu3 %v2456_v18  ;;  %1096 = vmatpush.msra.mxu1 %v2403_v8 }
  0x23   :  { %2270 = vmatpush.msra.mxu2 %v2403_v8 }
  0x24   :  { %1097 = vmatpush.msra.mxu1 %v2373_v1 }
  0x25   :  { %138 = vmatpush.xpose.msra.mxu0 %v2444_v16  ;;  %2272 = vmatpush.msra.mxu2 %v2373_v1 }
  0x26   :  { %2238 = vmatpush.xpose.msra.mxu3 %v2444_v16  ;;  %1098 = vmatpush.msra.mxu1 %v2415_v10 }
  0x27   :  { %108 = vadd.xlane.f32.xlu1 %v79_v29  ;;  %2274 = vmatpush.msra.mxu2 %v2415_v10 }
  0x28   :  { %110 = vadd.xlane.f32.xlu2 %v80_v30  ;;  %1099 = vmatpush.msra.mxu1 %v2387_v4 }
  0x29   :  { %106 = vadd.xlane.f32.xlu0 %v78_v31  ;;  %139 = vmatpush.xpose.msra.mxu0 %v2461_v19 }
  0x2a   :  { %2239 = vmatpush.xpose.msra.mxu3 %v2461_v19  ;;  %2276 = vmatpush.msra.mxu2 %v2387_v4 }
  0x2d   :  { %140 = vmatpush.xpose.msra.mxu0 %v2408_v9 }
  0x2e   :  { %2240 = vmatpush.xpose.msra.mxu3 %v2408_v9 }
  0x31   :  { %112 = vadd.xlane.f32.xlu0 %v81_v32  ;;  %141 = vmatpush.xpose.msra.mxu0 %v2382_v3 }
  0x32   :  { %2241 = vmatpush.xpose.msra.mxu3 %v2382_v3 }
  0x35   :  { %142 = vmatpush.xpose.msra.mxu0 %v2403_v8 }
  0x36   :  { %2242 = vmatpush.xpose.msra.mxu3 %v2403_v8 }
  0x39   :  { %143 = vmatpush.xpose.msra.mxu0 %v2373_v1 }
  0x3a   :  { %2243 = vmatpush.xpose.msra.mxu3 %v2373_v1 }
  0x3d   :  { %144 = vmatpush.xpose.msra.mxu0 %v2415_v10 }
  0x3e   :  { %2244 = vmatpush.xpose.msra.mxu3 %v2415_v10 }
  0x40   :  { %265 = vperm.xlu1 %2283, %v50_v33   ;;  %268 = vperm.xlu2 %2284, %v51_v34  }
  0x41   :  { %145 = vmatpush.xpose.msra.mxu0 %v2387_v4 }
  0x42   :  { %2245 = vmatpush.xpose.msra.mxu3 %v2387_v4 }
  0x44   :  { %146 = vmatmul.f32.vlgmr.msra.gmra.mxu0 %v2387_v4 }
  0x45   :  { %176 = vmatmul.f32.vlgmr.msra.gmra.mxu3 %v2470_v21  ;;  %307 = vperm.xlu0 %2285, %v64_v35  }
  0x46   :  { %2247 = vmatpush.msrb.mxu3 %v2368_v0 }
  0x48   :  { %2249 = vmatpush.msrb.mxu3 %v2392_v5  ;;  %271 = vperm.xlu1 %2283, %v52_v36  }
  0x49   :  { %310 = vperm.xlu2 %2284, %v65_v37  }
  0x4a   :  { %2251 = vmatpush.msrb.mxu3 %v2420_v11 }
  0x4c   :  { %2253 = vmatpush.msrb.mxu3 %v2437_v15  ;;  %149 = vmatmul.f32.gmra.mxu0 %v2415_v10 }
  0x4d   :  { %179 = vmatmul.f32.gmra.mxu3 %v2451_v17  ;;  %301 = vperm.xlu0 %2285, %v62_v38  }
  0x4e   :  { %2255 = vmatpush.msrb.mxu3 %v2451_v17 }
  0x50   :  { %2257 = vmatpush.msrb.mxu3 %v2470_v21  ;;  %277 = vperm.xlu1 %2283, %v54_v39  }
  0x51   :  { %274 = vperm.xlu2 %2284, %v53_v40  }
  0x52   :  { %2259 = vmatpush.msrb.mxu3 %v2483_v24 }
  0x54   :  { %2261 = vmatpush.msrb.mxu3 %v2456_v18  ;;  %152 = vmatmul.f32.gmra.mxu0 %v2373_v1 }
  0x55   :  { %182 = vmatmul.f32.gmra.mxu3 %v2437_v15  ;;  %295 = vperm.xlu0 %2285, %v60_v41  }
  0x56   :  { %2263 = vmatpush.msrb.mxu3 %v2444_v16 }
  0x58   :  { %2265 = vmatpush.msrb.mxu3 %v2461_v19  ;;  %283 = vperm.xlu1 %2283, %v56_v42  }
  0x59   :  { %280 = vperm.xlu2 %2284, %v55_v43  }
  0x5a   :  { %2267 = vmatpush.msrb.mxu3 %v2408_v9 }
  0x5c   :  { %2269 = vmatpush.msrb.mxu3 %v2382_v3  ;;  %155 = vmatmul.f32.gmra.mxu0 %v2403_v8 }
  0x5d   :  { %185 = vmatmul.f32.gmra.mxu3 %v2420_v11 }
  0x5e   :  { %2271 = vmatpush.msrb.mxu3 %v2403_v8 }
  0x60   :  { %2273 = vmatpush.msrb.mxu3 %v2373_v1  ;;  %286 = vperm.xlu1 %2283, %v57_v44  }
  0x61   :  { %289 = vperm.xlu2 %2284, %v58_v45  }
  0x62   :  { %2275 = vmatpush.msrb.mxu3 %v2415_v10 }
  0x64   :  { %2277 = vmatpush.msrb.mxu3 %v2387_v4  ;;  %158 = vmatmul.f32.gmra.mxu0 %v2382_v3 }
  0x65   :  { %188 = vmatmul.f32.gmra.mxu3 %v2392_v5  ;;  %v2655_v5 = vld [vmem:[#allocation2] ss:$0 sm:$0xff] }
  0x68   :  { %292 = vperm.xlu1 %2283, %v59_v46  }
  0x69   :  { %298 = vperm.xlu2 %2284, %v61_v47  }
  0x6c   :  { %161 = vmatmul.f32.gmra.mxu0 %v2408_v9  ;;  %v329_v9 = vlaneseq }
  0x6d   :  { %191 = vmatmul.f32.gmra.mxu3 %v2368_v0 }
  0x6e   :  { %v2669_v11 = vand.u32 127, %v329_v9 }
  0x70   :  { %304 = vperm.xlu1 %2283, %v63_v48   ;;  %vm331_vm3 = vcmp.lt.s32.totalorder %v2669_v11, 24 }
  0x74   :  { %164 = vmatmul.f32.gmra.mxu0 %v2461_v19 }
  0x7a   :  { %v2618_v49 = vpop.xlane.xlu1 %86 }
  0x7b   :  { %v2620_v50 = vpop.xlane.xlu2 %90 }
  0x7c   :  { %v83_v51 = vpop.xlane.xlu0 %82  ;;  %167 = vmatmul.f32.gmra.mxu0 %v2444_v16 }
  0x82   :  { %v2623_v52 = vpop.xlane.xlu1 %88 }
  0x83   :  { %v2625_v53 = vpop.xlane.xlu2 %92  ;;  %v202_v23 = vadd.f32 %v2631_v55, %v2623_v52  ;;  %v3936_v52 = vmov 0 }
  0x84   :  { %v85_v54 = vpop.xlane.xlu0 %84  ;;  %170 = vmatmul.f32.gmra.mxu0 %v2456_v18  ;;  %v199_v18 = vadd.f32 %v2631_v55, %v83_v51  ;;  %v201_v51 = vadd.f32 %v2631_v55, %v2618_v49 }
  0x85   :  { %v200_v32 = vadd.f32 %v2631_v55, %v85_v54 }
  0x8a   :  { %v97_v56 = vpop.xlane.xlu1 %96 }
  0x8b   :  { %v99_v57 = vpop.xlane.xlu2 %98  ;;  %v2634_v58 = vadd.f32 %v2631_v55, %v97_v56 }
  0x8c   :  { %v2636_v59 = vpop.xlane.xlu0 %94  ;;  %v2639_v60 = vadd.f32 %v2631_v55, %v99_v57  ;;  %173 = vmatmul.f32.gmra.mxu0 %v2483_v24 }
  0x92   :  { %v2649_v1 = vpop.xlane.xlu1 %102 }
  0x93   :  { %v2642_v61 = vpop.xlane.xlu2 %104 }
  0x94   :  { %v101_v62 = vpop.xlane.xlu0 %100  ;;  %v210_v42 = vadd.f32 %v2631_v55, %v2642_v61 }
  0x95   :  { %v2645_v63 = vadd.f32 %v2631_v55, %v101_v62 }
  0x9a   :  { %v2653_v4 = vpop.xlane.xlu1 %108 }
  0x9b   :  { %v2647_v0 = vpop.xlane.xlu2 %110 }
  0x9c   :  { %v2651_v3 = vpop.xlane.xlu0 %106 }
  0xa3   :  { %v269_v2 = vpop.permute.xlu2 %268 }
  0xa4   :  { %v2665_v7 = vpop.xlane.xlu0 %112  ;;  %vm314_vm7 = vcmp.eq.s32.totalorder %v269_v2, %v2655_v5 }
  0xa5   :  { %vm349_vm12 = vmxor %vm314_vm7, %vm3893_vm1 }
  0xa6   :  { %vm2720_vm15 = vmand %vm314_vm7, %vm331_vm3 }
  0xab   :  { %v2657_v6 = vpop.permute.xlu2 %310 }
  0xac   :  { %vm3889_vm0 = vcmp.eq.s32.totalorder %v2657_v6, %v2655_v5 }
  0xad   :  { %vm363_vm2 = vmxor %vm3889_vm0, %vm3893_vm1 }
  0xae   :  { %vm2678_vm4 = vmand %vm363_vm2, %vm331_vm3 }
  0xaf   :  { %vm2728_vm2 = vmand %vm349_vm12, %vm331_vm3 }
  0xb2   :  { %v266_v8 = vpop.permute.xlu1 %265 }
  0xb3   :  { %v2667_v10 = vpop.permute.xlu2 %274  ;;  %vm313_vm5 = vcmp.eq.s32.totalorder %v266_v8, %v2655_v5 }
  0xb4   :  { %vm348_vm6 = vmxor %vm313_vm5, %vm3893_vm1 }
  0xb5   :  { %vm364_vm8 = vmand %vm348_vm6, %vm331_vm3 }
  0xb6   :  { %vm332_vm10 = vmand %vm313_vm5, %vm331_vm3 }
  0xb7   :  { %v2671_v12 = vpop.permute.xlu0 %307 }
  0xba   :  { %v272_v13 = vpop.permute.xlu1 %271 }
  0xbb   :  { %v2674_v14 = vpop.permute.xlu2 %280  ;;  %vm315_vm13 = vcmp.eq.s32.totalorder %v272_v13, %v2655_v5 }
  0xbc   :  { %vm350_vm5 = vmxor %vm315_vm13, %vm3893_vm1 }
  0xbd   :  { %vm2766_vm0 = vmand %vm350_vm5, %vm331_vm3 }
  0xbf   :  { %v2683_v16 = vpop.permute.xlu0 %301 }
  0xc1   :  { %v147_v17 = vpop.f32.mrf.mxu0 }
  0xc2   :  { %v215_v19 = vmul.f32 2.0, %v147_v17  ;;  %v2687_v20 = vpop.permute.xlu1 %277 }
  0xc3   :  { %v290_v21 = vpop.permute.xlu2 %289 }
  0xc4   :  { %v231_v22 = vsub.f32 %v199_v18, %v215_v19  ;;  %vm321_vm9 = vcmp.eq.s32.totalorder %v290_v21, %v2655_v5 }
  0xc5   :  { %vm2698_vm11 = vmxor %vm321_vm9, %vm3893_vm1 }
  0xc6   :  { %v247_v24 = vmax.f32 %v231_v22, 1e-12 }
  0xc7   :  { %v2708_v26 = vpop.permute.xlu0 %295 }
  0xc8   :  { %v2706_v25 = vpop.f32.mrf.mxu3  ;;  %v2710_v27 = vsel %vm364_vm8, %v247_v24, inf  ;;  %v2712_v28 = vsel %vm332_vm10, %v247_v24, -inf  ;;  %vm3892_vm14 = vcmp.eq.s32.totalorder %v2708_v26, %v2655_v5 }
  0xc9   :  { %v150_v30 = vpop.f32.mrf.mxu0  ;;  %444 = vmin.xlane.f32.xlu0 %v2710_v27  ;;  %412 = vmax.xlane.f32.xlu2 %v2712_v28  ;;  %vm358_vm7 = vmxor %vm3892_vm14, %vm3893_vm1 }
  0xca   :  { %v216_v33 = vmul.f32 2.0, %v150_v30  ;;  %v2736_v34 = vpop.permute.xlu1 %283 }
  0xcb   :  { %vm3890_vm6 = vcmp.eq.s32.totalorder %v2736_v34, %v2655_v5  ;;  %v2744_v35 = vpop.permute.xlu2 %298 }
  0xcc   :  { %v232_v36 = vsub.f32 %v200_v32, %v216_v33  ;;  %vm2750_vm8 = vmxor %vm3890_vm6, %vm3893_vm1  ;;  %vm3891_vm10 = vcmp.eq.s32.totalorder %v2744_v35, %v2655_v5  ;;  %v3938_v32 = vmov 0 }
  0xcd   :  { %vm2760_vm12 = vmxor %vm3891_vm10, %vm3893_vm1 }
  0xce   :  { %v248_v39 = vmax.f32 %v232_v36, 1e-12  ;;  %vm2782_vm6 = vmand %vm358_vm7, %vm331_vm3 }
  0xd0   :  { %v180_v40 = vpop.f32.mrf.mxu3  ;;  %v2774_v44 = vsel %vm2728_vm2, %v248_v39, inf  ;;  %v2778_v45 = vsel %vm2720_vm15, %v248_v39, -inf  ;;  %vm2792_vm2 = vmand %vm321_vm9, %vm331_vm3 }
  0xd1   :  { %v226_v43 = vmul.f32 2.0, %v180_v40  ;;  %v153_v47 = vpop.f32.mrf.mxu0  ;;  %446 = vmin.xlane.f32.xlu0 %v2774_v44  ;;  %414 = vmax.xlane.f32.xlu2 %v2778_v45  ;;  %vm2802_vm15 = vmand %vm2750_vm8, %vm331_vm3  ;;  %v203_v40 = vadd.f32 %v2631_v55, %v2620_v50  ;;  %v209_v50 = vadd.f32 %v2631_v55, %v2649_v1 }
  0xd2   :  { %v217_v56 = vmul.f32 2.0, %v153_v47  ;;  %v287_v57 = vpop.permute.xlu1 %286  ;;  %vm334_vm9 = vmand %vm315_vm13, %vm331_vm3  ;;  %vm316_vm13 = vcmp.eq.s32.totalorder %v2667_v10, %v2655_v5  ;;  %v212_v10 = vadd.f32 %v2631_v55, %v2653_v4  ;;  %v225_v4 = vmul.f32 2.0, %v2706_v25 }
  0xd3   :  { %v242_v54 = vsub.f32 %v210_v42, %v226_v43  ;;  %vm320_vm5 = vcmp.eq.s32.totalorder %v287_v57, %v2655_v5  ;;  %vm2818_vm8 = vmand %vm2698_vm11, %vm331_vm3 }
  0xd4   :  { %v233_v62 = vsub.f32 %v201_v51, %v217_v56  ;;  %vm355_vm7 = vmxor %vm320_vm5, %vm3893_vm1  ;;  %v241_v57 = vsub.f32 %v209_v50, %v225_v4 }
  0xd5   :  { %v2812_v49 = vmax.f32 %v242_v54, 1e-12  ;;  %vm2824_vm10 = vmand %vm320_vm5, %vm331_vm3  ;;  %v213_v54 = vadd.f32 %v2631_v55, %v2647_v0  ;;  %v204_v0 = vadd.f32 %v2631_v55, %v2625_v53  ;;  %v211_v53 = vadd.f32 %v2631_v55, %v2651_v3 }
  0xd6   :  { %v249_v8 = vmax.f32 %v233_v62, 1e-12  ;;  %vm2832_vm14 = vmand %vm355_vm7, %vm331_vm3 }
  0xd7   :  { %vm375_vm11 = vmand %vm2760_vm12, %vm331_vm3 }
  0xd8   :  { %v183_v13 = vpop.f32.mrf.mxu3  ;;  %v2838_v18 = vsel %vm2766_vm0, %v249_v8, inf  ;;  %v2840_v19 = vsel %vm334_vm9, %v249_v8, -inf  ;;  %v2849_v22 = vsel %vm375_vm11, %v2812_v49, inf  ;;  %vm351_vm0 = vmxor %vm316_vm13, %vm3893_vm1 }
  0xd9   :  { %v156_v21 = vpop.f32.mrf.mxu0  ;;  %448 = vmin.xlane.f32.xlu0 %v2838_v18  ;;  %416 = vmax.xlane.f32.xlu2 %v2840_v19  ;;  %vm335_vm5 = vmand %vm316_vm13, %vm331_vm3 }
  0xda   :  { %v218_v24 = vmul.f32 2.0, %v156_v21  ;;  %v293_v29 = vpop.permute.xlu1 %292  ;;  %vm367_vm13 = vmand %vm351_vm0, %vm331_vm3 }
  0xdb   :  { %vm322_vm12 = vcmp.eq.s32.totalorder %v293_v29, %v2655_v5  ;;  %v227_v29 = vmul.f32 2.0, %v183_v13 }
  0xdc   :  { %v234_v30 = vsub.f32 %v202_v23, %v218_v24  ;;  %vm357_vm9 = vmxor %vm322_vm12, %vm3893_vm1 }
  0xdd   :  { %vm2866_vm7 = vmand %vm357_vm9, %vm331_vm3  ;;  %vm317_vm9 = vcmp.eq.s32.totalorder %v2687_v20, %v2655_v5 }
  0xde   :  { %v3937_v52 = vsel %vm2866_vm7, 4294967295, %v3936_v52  ;;  %v250_v31 = vmax.f32 %v234_v30, 1e-12  ;;  %vm2872_vm11 = vmand %vm322_vm12, %vm331_vm3 }
  0xdf   :  { %v3939_v32 = vsel %vm2872_vm11, 4294967295, %v3938_v32  ;;  %vm352_vm12 = vmxor %vm317_vm9, %vm3893_vm1  ;;  %vm3944_vm11 = vcmp.eq.s32.totalorder %v2744_v35, %v2655_v5 }
  0xe0   :  { %v186_v33 = vpop.f32.mrf.mxu3  ;;  %v2880_v37 = vsel %vm335_vm5, %v250_v31, -inf  ;;  %v2882_v38 = vsel %vm367_vm13, %v250_v31, inf  ;;  %vm336_vm5 = vmand %vm317_vm9, %vm331_vm3  ;;  %vm327_vm9 = vcmp.eq.s32.totalorder %v2671_v12, %v2655_v5 }
  0xe1   :  { %v228_v36 = vmul.f32 2.0, %v186_v33  ;;  %v159_v39 = vpop.f32.mrf.mxu0  ;;  %418 = vmax.xlane.f32.xlu0 %v2880_v37  ;;  %450 = vmin.xlane.f32.xlu2 %v2882_v38  ;;  %vm368_vm1 = vmand %vm352_vm12, %vm331_vm3  ;;  %vm3896_vm12 = vcmp.eq.s32.totalorder %v2674_v14, %v2655_v5  ;;  %v257_v33 = vmax.f32 %v241_v57, 1e-12 }
  0xe2   :  { %v219_v42 = vmul.f32 2.0, %v159_v39  ;;  %v2890_v43 = vpop.permute.xlu1 %304  ;;  %vm343_vm7 = vmand %vm3944_vm11, %vm331_vm3 }
  0xe3   :  { %v244_v41 = vsub.f32 %v212_v10, %v228_v36  ;;  %vm3895_vm0 = vcmp.eq.s32.totalorder %v2890_v43, %v2655_v5  ;;  %v214_v36 = vadd.f32 %v2631_v55, %v2665_v7  ;;  %v2990_v57 = vsel %vm343_vm7, %v2812_v49, -inf }
  0xe4   :  { %v235_v20 = vsub.f32 %v203_v40, %v219_v42  ;;  %vm345_vm13 = vmand %vm3895_vm0, %vm331_vm3  ;;  %v205_v42 = vadd.f32 %v2631_v55, %v2636_v59  ;;  %vm3948_vm7 = vcmp.eq.s32.totalorder %v2890_v43, %v2655_v5  ;;  %v3040_v9 = vsel %vm2782_vm6, %v257_v33, inf }
  0xe5   :  { %v2896_v47 = vmax.f32 %v244_v41, 1e-12 }
  0xe6   :  { %v251_v51 = vmax.f32 %v235_v20, 1e-12 }
  0xe7   :  { %v2912_v56 = vsel %vm345_vm13, %v2896_v47, -inf }
  0xe8   :  { %v189_v25 = vpop.f32.mrf.mxu3  ;;  %v2914_v1 = vsel %vm336_vm5, %v251_v51, -inf  ;;  %v2916_v8 = vsel %vm368_vm1, %v251_v51, inf  ;;  %vm346_vm1 = vmand %vm327_vm9, %vm331_vm3  ;;  %vm3940_vm5 = vcmp.eq.s32.totalorder %v2708_v26, %v2655_v5  ;;  %v243_v26 = vsub.f32 %v211_v53, %v227_v29 }
  0xe9   :  { %v229_v62 = vmul.f32 2.0, %v189_v25  ;;  %420 = vmax.xlane.f32.xlu1 %v2914_v1  ;;  %v162_v21 = vpop.f32.mrf.mxu0  ;;  %452 = vmin.xlane.f32.xlu2 %v2916_v8  ;;  %vm342_vm13 = vmand %vm3940_vm5, %vm331_vm3 }
  0xea   :  { %v220_v24 = vmul.f32 2.0, %v162_v21  ;;  %vm337_vm5 = vmand %vm3896_vm12, %vm331_vm3  ;;  %v2952_v41 = vsel %vm342_vm13, %v257_v33, -inf  ;;  %v259_v12 = vmax.f32 %v243_v26, 1e-12 }
  0xeb   :  { %v245_v23 = vsub.f32 %v213_v54, %v229_v62 }
  0xec   :  { %v236_v30 = vsub.f32 %v204_v0, %v220_v24 }
  0xed   :  { %v261_v31 = vmax.f32 %v245_v23, 1e-12 }
  0xee   :  { %v252_v13 = vmax.f32 %v236_v30, 1e-12 }
  0xef   :  { %v2938_v10 = vsel %vm346_vm1, %v261_v31, -inf  ;;  %vm3941_vm1 = vmmov 1  }
  0xf0   :  { %v192_v39 = vpop.f32.mrf.mxu3  ;;  %440 = vmax.xlane.f32.xlu0 %v2938_v10  ;;  %v2950_v40 = vsel %vm337_vm5, %v252_v13, -inf  ;;  %vm362_vm0 = vmxor %vm327_vm9, %vm3941_vm1  ;;  %vm3942_vm5 = vcmp.eq.s32.totalorder %v2683_v16, %v2655_v5 }
  0xf1   :  { %v230_v3 = vmul.f32 2.0, %v192_v39  ;;  %v165_v7 = vpop.f32.mrf.mxu0  ;;  %422 = vmax.xlane.f32.xlu2 %v2950_v40  ;;  %432 = vmax.xlane.f32.xlu1 %v2952_v41  ;;  %vm360_vm12 = vmxor %vm3942_vm5, %vm3941_vm1 }
  0xf2   :  { %v221_v20 = vmul.f32 2.0, %v165_v7  ;;  %vm378_vm13 = vmand %vm362_vm0, %vm331_vm3  ;;  %vm3946_vm0 = vcmp.eq.s32.totalorder %v2736_v34, %v2655_v5 }
  0xf3   :  { %v246_v4 = vsub.f32 %v214_v36, %v230_v3  ;;  %vm376_vm9 = vmand %vm360_vm12, %vm331_vm3  ;;  %v2970_v54 = vsel %vm378_vm13, %v261_v31, inf }
  0xf4   :  { %v237_v50 = vsub.f32 %v205_v42, %v221_v20  ;;  %3943 = vst [vmem:[#allocation5_spill] sm:$0xff] %v2970_v54  ;;  %vm338_vm12 = vmand %vm3946_vm0, %vm331_vm3  ;;  %v2987_v25 = vsel %vm376_vm9, %v259_v12, inf  ;;  %vm3949_vm9 = vcmp.eq.s32.totalorder %v2657_v6, %v2655_v5 }
  0xf5   :  { %v262_v51 = vmax.f32 %v246_v4, 1e-12  ;;  %vm361_vm5 = vmxor %vm3948_vm7, %vm3941_vm1 }
  0xf6   :  { %v253_v55 = vmax.f32 %v237_v50, 1e-12  ;;  %vm377_vm13 = vmand %vm361_vm5, %vm331_vm3 }
  0xf7   :  { %v2979_v59 = vsel %vm2678_vm4, %v262_v51, inf  ;;  %vm3947_vm4 = vcmp.eq.s32.totalorder %v2674_v14, %v2655_v5  ;;  %v3022_v43 = vsel %vm377_vm13, %v2896_v47, inf }
  0xf8   :  { %3945 = vst [vmem:[#allocation6_spill] sm:$0xff] %v2979_v59  ;;  %472 = vmin.xlane.f32.xlu0 %v2970_v54  ;;  %v2992_v35 = vsel %vm338_vm12, %v253_v55, -inf  ;;  %v2996_v15 = vsel %vm2802_vm15, %v253_v55, inf  ;;  %vm353_vm11 = vmxor %vm3947_vm4, %vm3941_vm1 }
  0xf9   :  { %v168_v62 = vpop.f32.mrf.mxu0  ;;  %468 = vmin.xlane.f32.xlu2 %v2987_v25  ;;  %434 = vmax.xlane.f32.xlu1 %v2990_v57  ;;  %vm369_vm15 = vmand %vm353_vm11, %vm331_vm3 }
  0xfa   :  { %v222_v34 = vmul.f32 2.0, %v168_v62  ;;  %v3013_v14 = vsel %vm369_vm15, %v252_v13, inf  ;;  %vm347_vm1 = vmand %vm3949_vm9, %vm331_vm3 }
  0xfc   :  { %v238_v61 = vsub.f32 %v2634_v58, %v222_v34  ;;  %v3024_v58 = vsel %vm347_vm1, %v262_v51, -inf }
  0xfe   :  { %v254_v49 = vmax.f32 %v238_v61, 1e-12 }
 0x100   :  { %454 = vmin.xlane.f32.xlu0 %v3013_v14  ;;  %v3028_v21 = vsel %vm2824_vm10, %v254_v49, -inf  ;;  %v3032_v0 = vsel %vm2832_vm14, %v254_v49, inf  ;;  %vm3950_vm14 = vcmp.eq.s32.totalorder %v2683_v16, %v2655_v5  ;;  %vm3951_vm10 = vnez %v3937_v52 }
 0x101   :  { %v171_v23 = vpop.f32.mrf.mxu0  ;;  %470 = vmin.xlane.f32.xlu2 %v3022_v43  ;;  %442 = vmax.xlane.f32.xlu1 %v3024_v58  ;;  %vm344_vm6 = vmand %vm3950_vm14, %vm331_vm3  ;;  %vm2127_vm3 = vcmask 7168  }
 0x102   :  { %v223_v6 = vmul.f32 2.0, %v171_v23  ;;  %v3059_v48 = vsel %vm344_vm6, %v259_v12, -inf }
 0x104   :  { %v239_v24 = vsub.f32 %v2639_v60, %v223_v6 }
 0x106   :  { %v255_v47 = vmax.f32 %v239_v24, 1e-12 }
 0x108   :  { %424 = vmax.xlane.f32.xlu0 %v2992_v35  ;;  %v3044_v17 = vsel %vm2792_vm2, %v255_v47, -inf  ;;  %v3048_v29 = vsel %vm2818_vm8, %v255_v47, inf  ;;  %vm3952_vm2 = vnez %v3939_v32 }
 0x109   :  { %v174_v30 = vpop.f32.mrf.mxu0  ;;  %464 = vmin.xlane.f32.xlu2 %v3040_v9  ;;  %428 = vmax.xlane.f32.xlu1 %v3044_v17 }
 0x10a   :  { %v224_v60 = vmul.f32 2.0, %v174_v30 }
 0x10c   :  { %v240_v31 = vsub.f32 %v2645_v63, %v224_v60  ;;  %v3897_v63 = vmov 0.0  }
 0x10d   :  { %2131 = vst.msk [vmem:[%s3888_s4 + $0x18] sm:$0xff] %vm2127_vm3, %v3897_v63 }
 0x10e   :  { %v256_v46 = vmax.f32 %v240_v31, 1e-12  ;;  %2132 = vst.msk [vmem:[%s3888_s4 + $0x20] sm:$0xff] %vm2127_vm3, %v3897_v63 }
 0x10f   :  { %2133 = vst.msk [vmem:[%s3888_s4 + $0x28] sm:$0xff] %vm2127_vm3, %v3897_v63 }
 0x110   :  { %456 = vmin.xlane.f32.xlu0 %v2996_v15  ;;  %v3063_v2 = vsel %vm3951_vm10, %v256_v46, inf  ;;  %v3067_v33 = vsel %vm3952_vm2, %v256_v46, -inf  ;;  %2134 = vst.msk [vmem:[%s3888_s4 + $0x30] sm:$0xff] %vm2127_vm3, %v3897_v63 }
 0x111   :  { %436 = vmax.xlane.f32.xlu2 %v3059_v48  ;;  %460 = vmin.xlane.f32.xlu1 %v3048_v29  ;;  %2135 = vst.msk [vmem:[%s3888_s4 + $0x38] sm:$0xff] %vm2127_vm3, %v3897_v63 }
 0x112   :  { %2136 = vst.msk [vmem:[%s3888_s4 + $0x40] sm:$0xff] %vm2127_vm3, %v3897_v63 }
 0x113   :  { %2137 = vst.msk [vmem:[%s3888_s4 + $0x48] sm:$0xff] %vm2127_vm3, %v3897_v63 }
 0x114   :  { %2138 = vst.msk [vmem:[%s3888_s4 + $0x50] sm:$0xff] %vm2127_vm3, %v3897_v63 }
 0x115   :  { %2139 = vst.msk [vmem:[%s3888_s4 + $0x58] sm:$0xff] %vm2127_vm3, %v3897_v63 }
 0x116   :  { %2140 = vst.msk [vmem:[%s3888_s4 + $0x60] sm:$0xff] %vm2127_vm3, %v3897_v63 }
 0x117   :  { %2141 = vst.msk [vmem:[%s3888_s4 + $0x68] sm:$0xff] %vm2127_vm3, %v3897_v63 }
 0x118   :  { %426 = vmax.xlane.f32.xlu0 %v3028_v21  ;;  %2142 = vst.msk [vmem:[%s3888_s4 + $0x70] sm:$0xff] %vm2127_vm3, %v3897_v63 }
 0x119   :  { %462 = vmin.xlane.f32.xlu1 %v3063_v2  ;;  %2143 = vst.msk [vmem:[%s3888_s4 + $0x78] sm:$0xff] %vm2127_vm3, %v3897_v63 }
 0x120   :  { %458 = vmin.xlane.f32.xlu0 %v3032_v0 }
 0x128   :  { %430 = vmax.xlane.f32.xlu0 %v3067_v33 }
 0x13c   :  { %v3125_v5 = vpop.xlane.xlu2 %412  ;;  %v3132_v16 = vpop.xlane.xlu0 %444 }
 0x13d   :  { %2288 = vrsqrt.f32 %v3125_v5  ;;  %vm476_vm8 = vcmp.eq.f32.partialorder %v2712_v28, %v3125_v5  ;;  %vm732_vm0 = vcmp.eq.f32.partialorder %v2710_v27, %v3132_v16  ;;  %vm1412_vm11 = vcmp.eq.f32.partialorder %v3125_v5, inf }
 0x13e   :  { %2290 = vrsqrt.f32 %v3132_v16  ;;  %v3151_v52 = vsel %vm476_vm8, %v2669_v11, 4294967295  ;;  %v3154_v32 = vsel %vm732_vm0, %v2669_v11, 4294967295  ;;  %vm1414_vm7 = vcmp.eq.f32.partialorder %v3125_v5, 0.0 }
 0x13f   :  { %v509_v53 = vshra.s32 %v3151_v52, 16  ;;  %v765_v13 = vshra.s32 %v3154_v32, 16  ;;  %vm1604_vm5 = vcmp.eq.f32.partialorder %v3132_v16, inf  ;;  %vm1606_vm15 = vcmp.eq.f32.partialorder %v3132_v16, 0.0 }
 0x141   :  { %v3158_v39 = vcvt.s32.f32 %v509_v53  ;;  %v3160_v26 = vcvt.s32.f32 %v765_v13 }
 0x143   :  { %v2289_v36 = vpop.eup %2288  ;;  %512 = vmax.xlane.f32.xlu1 %v3158_v39  ;;  %768 = vmax.xlane.f32.xlu0 %v3160_v26 }
 0x144   :  { %v2291_v3 = vpop.eup %2290  ;;  %v1406_v28 = vmul.f32 %v2289_v36, %v3125_v5  ;;  %v3163_v7 = vpop.xlane.xlu2 %414 }
 0x145   :  { %v3165_v27 = vpop.xlane.xlu0 %446  ;;  %v1598_v42 = vmul.f32 %v2291_v3, %v3132_v16  ;;  %2292 = vrsqrt.f32 %v3163_v7  ;;  %vm477_vm12 = vcmp.eq.f32.partialorder %v2778_v45, %v3163_v7  ;;  %vm1424_vm13 = vcmp.eq.f32.partialorder %v3163_v7, inf }
 0x146   :  { %v1407_v4 = vmul.f32 %v2289_v36, %v1406_v28  ;;  %2294 = vrsqrt.f32 %v3165_v27  ;;  %v3175_v12 = vsel %vm477_vm12, %v2669_v11, 4294967295  ;;  %vm733_vm4 = vcmp.eq.f32.partialorder %v2774_v44, %v3165_v27 }
 0x147   :  { %v1599_v20 = vmul.f32 %v2291_v3, %v1598_v42  ;;  %v523_v55 = vshra.s32 %v3175_v12, 16  ;;  %v3181_v62 = vsel %vm733_vm4, %v2669_v11, 4294967295  ;;  %v1415_v44 = vand.u32 2147483648, %v3125_v5 }
 0x148   :  { %v1408_v50 = vmul.f32 0.5, %v1407_v4  ;;  %v779_v61 = vshra.s32 %v3181_v62, 16  ;;  %vm1426_vm9 = vcmp.eq.f32.partialorder %v3163_v7, 0.0  ;;  %vm1616_vm6 = vcmp.eq.f32.partialorder %v3165_v27, inf }
 0x149   :  { %v1600_v51 = vmul.f32 0.5, %v1599_v20  ;;  %v3186_v23 = vcvt.s32.f32 %v523_v55  ;;  %vm1618_vm2 = vcmp.eq.f32.partialorder %v3165_v27, 0.0 }
 0x14a   :  { %v1409_v34 = vsub.f32 1.5, %v1408_v50  ;;  %v3190_v30 = vcvt.s32.f32 %v779_v61  ;;  %v1427_v50 = vand.u32 2147483648, %v3163_v7 }
 0x14b   :  { %v2293_v49 = vpop.eup %2292  ;;  %v1601_v45 = vsub.f32 1.5, %v1600_v51  ;;  %526 = vmax.xlane.f32.xlu2 %v3186_v23 }
 0x14c   :  { %v2295_v6 = vpop.eup %2294  ;;  %v1410_v24 = vmul.f32 %v2289_v36, %v1409_v34  ;;  %v1418_v47 = vmul.f32 %v2293_v49, %v3163_v7  ;;  %v3192_v60 = vpop.xlane.xlu2 %416  ;;  %v1607_v36 = vand.u32 2147483648, %v3132_v16  ;;  %782 = vmax.xlane.f32.xlu0 %v3190_v30 }
 0x14d   :  { %v3194_v31 = vpop.xlane.xlu0 %448  ;;  %v1602_v46 = vmul.f32 %v2291_v3, %v1601_v45  ;;  %v1610_v53 = vmul.f32 %v2295_v6, %v3165_v27  ;;  %2296 = vrsqrt.f32 %v3192_v60  ;;  %vm478_vm1 = vcmp.eq.f32.partialorder %v2840_v19, %v3192_v60 }
 0x14e   :  { %v1411_v13 = vmul.f32 %v1410_v24, %v3125_v5  ;;  %v1419_v28 = vmul.f32 %v2293_v49, %v1418_v47  ;;  %2298 = vrsqrt.f32 %v3194_v31  ;;  %v3224_v24 = vsel %vm478_vm1, %v2669_v11, 4294967295 }
 0x14f   :  { %v1603_v42 = vmul.f32 %v1602_v46, %v3132_v16  ;;  %v1611_v3 = vmul.f32 %v2295_v6, %v1610_v53  ;;  %vm734_vm14 = vcmp.eq.f32.partialorder %v2838_v18, %v3194_v31  ;;  %v537_v46 = vshra.s32 %v3224_v24, 16 }
 0x150   :  { %v1413_v4 = vsel %vm1412_vm11, %v3125_v5, %v1411_v13  ;;  %v1420_v20 = vmul.f32 0.5, %v1419_v28  ;;  %v3231_v53 = vsel %vm734_vm14, %v2669_v11, 4294967295  ;;  %vm1436_vm4 = vcmp.eq.f32.partialorder %v3192_v60, inf }
 0x151   :  { %v1416_v51 = vsel %vm1414_vm7, %v1415_v44, %v1413_v4  ;;  %v1605_v55 = vsel %vm1604_vm5, %v3132_v16, %v1603_v42  ;;  %v1612_v34 = vmul.f32 0.5, %v1611_v3  ;;  %v793_v13 = vshra.s32 %v3231_v53, 16 }
 0x152   :  { %v3221_v61 = vsel %vm1606_vm15, %v1607_v36, %v1605_v55  ;;  %v1421_v45 = vsub.f32 1.5, %v1420_v20  ;;  %v3236_v4 = vcvt.s32.f32 %v537_v46  ;;  %vm1438_vm11 = vcmp.eq.f32.partialorder %v3192_v60, 0.0 }
 0x153   :  { %3953 = vst [vmem:[#allocation7_spill] sm:$0xff] %v3221_v61  ;;  %v2297_v5 = vpop.eup %2296  ;;  %v1981_v44 = vsub.f32 %v1416_v51, %v3221_v61  ;;  %v1613_v47 = vsub.f32 1.5, %v1612_v34  ;;  %v3241_v55 = vcvt.s32.f32 %v793_v13  ;;  %vm1628_vm7 = vcmp.eq.f32.partialorder %v3194_v31, inf }
 0x154   :  { %v1422_v19 = vmul.f32 %v2293_v49, %v1421_v45  ;;  %v1430_v16 = vmul.f32 %v2297_v5, %v3192_v60  ;;  %v451_v36 = vpop.xlane.xlu2 %450  ;;  %v2299_v42 = vpop.eup %2298  ;;  %540 = vmax.xlane.f32.xlu1 %v3236_v4  ;;  %v1619_v45 = vand.u32 2147483648, %v3165_v27  ;;  %vm1630_vm5 = vcmp.eq.f32.partialorder %v3194_v31, 0.0 }
 0x155   :  { %v419_v28 = vpop.xlane.xlu0 %418  ;;  %v1997_v18 = vmax.f32 %v1981_v44, 0.0  ;;  %v1614_v3 = vmul.f32 %v2295_v6, %v1613_v47  ;;  %vm735_vm10 = vcmp.eq.f32.partialorder %v2882_v38, %v451_v36  ;;  %v1622_v49 = vmul.f32 %v2299_v42, %v3194_v31  ;;  %796 = vmax.xlane.f32.xlu2 %v3241_v55 }
 0x156   :  { %v1423_v20 = vmul.f32 %v1422_v19, %v3163_v7  ;;  %v1431_v51 = vmul.f32 %v2297_v5, %v1430_v16  ;;  %v3251_v38 = vsel %vm735_vm10, %v2669_v11, 4294967295  ;;  %vm479_vm8 = vcmp.eq.f32.partialorder %v2880_v37, %v419_v28 }
 0x157   :  { %2128 = vst.msk [vmem:[%s3888_s4] sm:$0xff] %vm2127_vm3, %v1997_v18  ;;  %v1615_v34 = vmul.f32 %v1614_v3, %v3165_v27  ;;  %v1623_v47 = vmul.f32 %v2299_v42, %v1622_v49  ;;  %v3265_v16 = vsel %vm479_vm8, %v2669_v11, 4294967295  ;;  %v807_v37 = vshra.s32 %v3251_v38, 16 }
 0x158   :  { %v1425_v6 = vsel %vm1424_vm13, %v3163_v7, %v1423_v20  ;;  %v1432_v44 = vmul.f32 0.5, %v1431_v51  ;;  %v551_v7 = vshra.s32 %v3265_v16, 16  ;;  %v764_v61 = vand.u32 65535, %v3154_v32 }
 0x159   :  { %v1428_v46 = vsel %vm1426_vm9, %v1427_v50, %v1425_v6  ;;  %v1617_v19 = vsel %vm1616_vm6, %v3165_v27, %v1615_v34  ;;  %v1624_v28 = vmul.f32 0.5, %v1623_v47  ;;  %v3271_v3 = vcvt.s32.f32 %v807_v37 }
 0x15a   :  { %v3268_v13 = vsel %vm1618_vm2, %v1619_v45, %v1617_v19  ;;  %v1433_v36 = vsub.f32 1.5, %v1432_v44  ;;  %v3275_v34 = vcvt.s32.f32 %v551_v7  ;;  %v1631_v37 = vand.u32 2147483648, %v3194_v31 }
 0x15b   :  { %3954 = vst [vmem:[#allocation8_spill] sm:$0xff] %v3268_v13  ;;  %v1982_v18 = vsub.f32 %v1428_v46, %v3268_v13  ;;  %v1625_v20 = vsub.f32 1.5, %v1624_v28  ;;  %810 = vmax.xlane.f32.xlu0 %v3271_v3  ;;  %v508_v13 = vand.u32 65535, %v3151_v52  ;;  %v522_v52 = vand.u32 65535, %v3175_v12 }
 0x15c   :  { %v1434_v50 = vmul.f32 %v2297_v5, %v1433_v36  ;;  %v421_v51 = vpop.xlane.xlu1 %420  ;;  %v453_v49 = vpop.xlane.xlu2 %452  ;;  %554 = vmax.xlane.f32.xlu1 %v3275_v34  ;;  %v778_v32 = vand.u32 65535, %v3181_v62  ;;  %v536_v12 = vand.u32 65535, %v3224_v24 }
 0x15d   :  { %v1998_v27 = vmax.f32 %v1982_v18, 0.0  ;;  %vm480_vm0 = vcmp.eq.f32.partialorder %v2914_v1, %v421_v51  ;;  %vm736_vm12 = vcmp.eq.f32.partialorder %v2916_v8, %v453_v49  ;;  %v1626_v45 = vmul.f32 %v2299_v42, %v1625_v20 }
 0x15e   :  { %v1435_v6 = vmul.f32 %v1434_v50, %v3192_v60  ;;  %v3281_v44 = vsel %vm480_vm0, %v2669_v11, 4294967295  ;;  %v3284_v5 = vsel %vm736_vm12, %v2669_v11, 4294967295  ;;  %v1439_v1 = vand.u32 2147483648, %v3192_v60 }
 0x15f   :  { %2129 = vst.msk [vmem:[%s3888_s4 + $0x8] sm:$0xff] %vm2127_vm3, %v1998_v27  ;;  %v565_v8 = vshra.s32 %v3281_v44, 16  ;;  %v821_v42 = vshra.s32 %v3284_v5, 16  ;;  %v1627_v46 = vmul.f32 %v1626_v45, %v3194_v31  ;;  %v524_v54 = vcvt.s32.f32 %v522_v52 }
 0x160   :  { %v1437_v47 = vsel %vm1436_vm4, %v3192_v60, %v1435_v6 }
 0x161   :  { %v1440_v19 = vsel %vm1438_vm11, %v1439_v1, %v1437_v47  ;;  %v3300_v36 = vcvt.s32.f32 %v565_v8  ;;  %v1629_v28 = vsel %vm1628_vm7, %v3194_v31, %v1627_v46  ;;  %v3307_v50 = vcvt.s32.f32 %v821_v42 }
 0x162   :  { %v3304_v7 = vsel %vm1630_vm5, %v1631_v37, %v1629_v28 }
 0x163   :  { %v441_v18 = vpop.xlane.xlu0 %440  ;;  %3955 = vst [vmem:[#allocation9_spill] sm:$0xff] %v3304_v7  ;;  %v1983_v60 = vsub.f32 %v1440_v19, %v3304_v7  ;;  %568 = vmax.xlane.f32.xlu0 %v3300_v36 }
 0x164   :  { %vm490_vm15 = vcmp.eq.f32.partialorder %v2938_v10, %v441_v18  ;;  %v3313_v51 = vpop.xlane.xlu1 %432  ;;  %v423_v27 = vpop.xlane.xlu2 %422  ;;  %824 = vmax.xlane.f32.xlu1 %v3307_v50 }
 0x165   :  { %v3311_v20 = vsel %vm490_vm15, %v2669_v11, 4294967295  ;;  %v1999_v49 = vmax.f32 %v1983_v60, 0.0  ;;  %vm481_vm13 = vcmp.eq.f32.partialorder %v2950_v40, %v423_v27  ;;  %vm486_vm5 = vcmp.eq.f32.partialorder %v2952_v41, %v3313_v51 }
 0x166   :  { %v705_v31 = vshra.s32 %v3311_v20, 16  ;;  %v3328_v45 = vsel %vm481_vm13, %v2669_v11, 4294967295 }
 0x167   :  { %2130 = vst.msk [vmem:[%s3888_s4 + $0x10] sm:$0xff] %vm2127_vm3, %v1999_v49  ;;  %v579_v8 = vshra.s32 %v3328_v45, 16 }
 0x168   :  { %v3325_v6 = vcvt.s32.f32 %v705_v31 }
 0x169   :  { %v3336_v47 = vcvt.s32.f32 %v579_v8 }
 0x16b   :  { %v3323_v10 = vpop.xlane.xlu0 %472  ;;  %708 = vmax.xlane.f32.xlu0 %v3325_v6 }
 0x16c   :  { %3956 = vst [vmem:[#allocation10_spill] sm:$0xff] %v3323_v10  ;;  %v3330_v1 = vpop.xlane.xlu1 %434  ;;  %474 = vmin.xlane.f32.xlu1 %v2979_v59 }
 0x173   :  { %v455_v42 = vpop.xlane.xlu0 %454  ;;  %582 = vmax.xlane.f32.xlu0 %v3336_v47 }
 0x174   :  { %vm737_vm3 = vcmp.eq.f32.partialorder %v3013_v14, %v455_v42  ;;  %v443_v46 = vpop.xlane.xlu1 %442 }
 0x175   :  { %v3339_v40 = vsel %vm737_vm3, %v2669_v11, 4294967295  ;;  %vm491_vm9 = vcmp.eq.f32.partialorder %v3024_v58, %v443_v46 }
 0x176   :  { %v835_v19 = vshra.s32 %v3339_v40, 16  ;;  %v3345_v37 = vsel %vm491_vm9, %v2669_v11, 4294967295 }
 0x177   :  { %v719_v18 = vshra.s32 %v3345_v37, 16 }
 0x178   :  { %v3347_v28 = vcvt.s32.f32 %v835_v19 }
 0x179   :  { %v3351_v14 = vcvt.s32.f32 %v719_v18 }
 0x17a   :  { %838 = vmax.xlane.f32.xlu2 %v3347_v28 }
 0x17b   :  { %v425_v60 = vpop.xlane.xlu0 %424  ;;  %722 = vmax.xlane.f32.xlu0 %v3351_v14 }
 0x17c   :  { %vm482_vm1 = vcmp.eq.f32.partialorder %v2992_v35, %v425_v60  ;;  %v429_v58 = vpop.xlane.xlu1 %428 }
 0x17d   :  { %v3355_v49 = vsel %vm482_vm1, %v2669_v11, 4294967295  ;;  %vm484_vm14 = vcmp.eq.f32.partialorder %v3044_v17, %v429_v58 }
 0x17e   :  { %v593_v27 = vshra.s32 %v3355_v49, 16  ;;  %v3363_v8 = vsel %vm484_vm14, %v2669_v11, 4294967295 }
 0x17f   :  { %3957 = vst [vmem:[#allocation11_spill] sm:$0xff] %v3363_v8  ;;  %v621_v35 = vshra.s32 %v3363_v8, 16 }
 0x180   :  { %v3360_v31 = vcvt.s32.f32 %v593_v27 }
 0x181   :  { %v3368_v46 = vcvt.s32.f32 %v621_v35 }
 0x182   :  { %596 = vmax.xlane.f32.xlu1 %v3360_v31 }
 0x183   :  { %v457_v42 = vpop.xlane.xlu0 %456  ;;  %466 = vmin.xlane.f32.xlu0 %v2849_v22  ;;  %3958 = vst [vmem:[#allocation12_spill] sm:$0xff] %v3368_v46 }
 0x184   :  { %vm738_vm6 = vcmp.eq.f32.partialorder %v2996_v15, %v457_v42  ;;  %v461_v35 = vpop.xlane.xlu1 %460 }
 0x185   :  { %v3374_v19 = vsel %vm738_vm6, %v2669_v11, 4294967295  ;;  %vm740_vm7 = vcmp.eq.f32.partialorder %v3048_v29, %v461_v35  ;;  %v704_v29 = vand.u32 65535, %v3311_v20  ;;  %v3450_v35 = vsel %vm486_vm5, %v2669_v11, 4294967295 }
 0x186   :  { %3959 = vst [vmem:[#allocation13_spill] sm:$0xff] %v3374_v19  ;;  %v849_v27 = vshra.s32 %v3374_v19, 16  ;;  %v550_v20 = vand.u32 65535, %v3265_v16 }
 0x188   :  { %v3385_v15 = vcvt.s32.f32 %v849_v27  ;;  %v552_v16 = vcvt.s32.f32 %v550_v20 }
 0x18a   :  { %624 = vmax.xlane.f32.xlu1 %v3368_v46  ;;  %3962 = vst [vmem:[#allocation16_spill] sm:$0xff] %v3385_v15  ;;  %v766_v46 = vcvt.s32.f32 %v764_v61 }
 0x18b   :  { %v427_v17 = vpop.xlane.xlu0 %426  ;;  %438 = vmax.xlane.f32.xlu0 %v2912_v56 }
 0x18c   :  { %vm483_vm10 = vcmp.eq.f32.partialorder %v3028_v21, %v427_v17  ;;  %v3388_v21 = vpop.xlane.xlu2 %468  ;;  %v3394_v7 = vpop.xlane.xlu1 %462 }
 0x18d   :  { %v3377_v18 = vsel %vm483_vm10, %v2669_v11, 4294967295  ;;  %vm744_vm1 = vcmp.eq.f32.partialorder %v2987_v25, %v3388_v21  ;;  %v792_v21 = vand.u32 65535, %v3231_v53 }
 0x18e   :  { %3960 = vst [vmem:[#allocation14_spill] sm:$0xff] %v3377_v18  ;;  %v607_v60 = vshra.s32 %v3377_v18, 16 }
 0x190   :  { %v3381_v58 = vcvt.s32.f32 %v607_v60 }
 0x192   :  { %3961 = vst [vmem:[#allocation15_spill] sm:$0xff] %v3381_v58  ;;  %610 = vmax.xlane.f32.xlu2 %v3381_v58  ;;  %v510_v58 = vcvt.s32.f32 %v508_v13  ;;  %v538_v13 = vcvt.s32.f32 %v536_v12 }
 0x193   :  { %852 = vmax.xlane.f32.xlu0 %v3385_v15  ;;  %v459_v17 = vpop.xlane.xlu0 %458 }
 0x194   :  { %v3390_v42 = vpop.xlane.xlu2 %470  ;;  %vm739_vm4 = vcmp.eq.f32.partialorder %v3032_v0, %v459_v17  ;;  %v3436_v0 = vsel %vm740_vm7, %v2669_v11, 4294967295  ;;  %v649_v17 = vshra.s32 %v3450_v35, 16  ;;  %vm741_vm7 = vcmp.eq.f32.partialorder %v3063_v2, %v3394_v7 }
 0x195   :  { %vm745_vm15 = vcmp.eq.f32.partialorder %v3022_v43, %v3390_v42 }
 0x196   :  { %v3460_v51 = vcvt.s32.f32 %v649_v17 }
 0x19b   :  { %v3396_v60 = vpop.xlane.xlu0 %430 }
 0x19c   :  { %v3392_v63 = vpop.xlane.xlu2 %464  ;;  %vm485_vm3 = vcmp.eq.f32.partialorder %v3067_v33, %v3396_v60  ;;  %v834_v60 = vand.u32 65535, %v3339_v40  ;;  %v3502_v40 = vsel %vm744_vm1, %v2669_v11, 4294967295 }
 0x19d   :  { %v3479_v42 = vsel %vm485_vm3, %v2669_v11, 4294967295 }
 0x19e   :  { %v635_v33 = vshra.s32 %v3479_v42, 16  ;;  %v836_v17 = vcvt.s32.f32 %v834_v60 }
 0x1a4   :  { %v3400_v27 = vpop.xlane.xlu2 %436 }
 0x1a5   :  { %vm488_vm3 = vcmp.eq.f32.partialorder %v3059_v48, %v3400_v27  ;;  %v3964_v48 = vld [vmem:[#allocation5_spill] sm:$0xff]  ;;  %v3965_v27 = vld [vmem:[#allocation6_spill] sm:$0xff] }
 0x1b6   :  { %v3402_v19 = vpop.xlane.xlu1 %512  ;;  %v3404_v15 = vpop.xlane.xlu0 %768 }
 0x1b7   :  { %vm514_vm2 = vcmp.eq.f32.partialorder %v3158_v39, %v3402_v19  ;;  %vm770_vm8 = vcmp.eq.f32.partialorder %v3160_v26, %v3404_v15  ;;  %v780_v39 = vcvt.s32.f32 %v778_v32  ;;  %v706_v32 = vcvt.s32.f32 %v704_v29 }
 0x1b8   :  { %v515_v18 = vsel %vm514_vm2, %v510_v58, -inf  ;;  %v771_v8 = vsel %vm770_vm8, %v766_v46, -inf }
 0x1b9   :  { %516 = vmax.xlane.f32.xlu2 %v515_v18  ;;  %772 = vmax.xlane.f32.xlu1 %v771_v8 }
 0x1be   :  { %v3412_v59 = vpop.xlane.xlu2 %526 }
 0x1bf   :  { %v3414_v10 = vpop.xlane.xlu0 %782  ;;  %vm528_vm0 = vcmp.eq.f32.partialorder %v3186_v23, %v3412_v59  ;;  %v3427_v23 = vsel %vm739_vm4, %v2669_v11, 4294967295 }
 0x1c0   :  { %v529_v61 = vsel %vm528_vm0, %v524_v54, -inf  ;;  %vm784_vm12 = vcmp.eq.f32.partialorder %v3190_v30, %v3414_v10  ;;  %v863_v30 = vshra.s32 %v3427_v23, 16 }
 0x1c1   :  { %530 = vmax.xlane.f32.xlu0 %v529_v61  ;;  %v785_v26 = vsel %vm784_vm12, %v780_v39, -inf  ;;  %v3464_v39 = vsel %vm745_vm15, %v2669_v11, 4294967295 }
 0x1c2   :  { %786 = vmax.xlane.f32.xlu2 %v785_v26  ;;  %v3433_v24 = vcvt.s32.f32 %v863_v30  ;;  %v947_v43 = vshra.s32 %v3464_v39, 16 }
 0x1c7   :  { %v3422_v62 = vpop.xlane.xlu1 %540 }
 0x1c8   :  { %vm542_vm11 = vcmp.eq.f32.partialorder %v3236_v4, %v3422_v62  ;;  %v877_v4 = vshra.s32 %v3436_v0, 16  ;;  %v3469_v26 = vpop.xlane.xlu2 %796 }
 0x1c9   :  { %v543_v54 = vsel %vm542_vm11, %v538_v13, -inf  ;;  %v3481_v13 = vcvt.s32.f32 %v947_v43  ;;  %vm798_vm10 = vcmp.eq.f32.partialorder %v3241_v55, %v3469_v26  ;;  %v794_v43 = vcvt.s32.f32 %v792_v21 }
 0x1ca   :  { %544 = vmax.xlane.f32.xlu1 %v543_v54  ;;  %v3446_v58 = vcvt.s32.f32 %v877_v4  ;;  %v718_v54 = vand.u32 65535, %v3345_v37  ;;  %v3497_v37 = vcvt.s32.f32 %v635_v33  ;;  %vm742_vm11 = vcmp.eq.f32.partialorder %v3040_v9, %v3392_v63 }
 0x1cb   :  { %v3550_v21 = vsel %vm741_vm7, %v2669_v11, 4294967295 }
 0x1cc   :  { %v720_v29 = vcvt.s32.f32 %v718_v54  ;;  %v578_v54 = vand.u32 65535, %v3328_v45  ;;  %v891_v7 = vshra.s32 %v3550_v21, 16 }
 0x1ce   :  { %v3430_v8 = vpop.xlane.xlu0 %810  ;;  %v580_v60 = vcvt.s32.f32 %v578_v54 }
 0x1cf   :  { %v3444_v18 = vpop.xlane.xlu1 %554  ;;  %vm812_vm15 = vcmp.eq.f32.partialorder %v3271_v3, %v3430_v8 }
 0x1d0   :  { %vm556_vm9 = vcmp.eq.f32.partialorder %v3275_v34, %v3444_v18 }
 0x1d1   :  { %v557_v12 = vsel %vm556_vm9, %v552_v16, -inf }
 0x1d2   :  { %866 = vmax.xlane.f32.xlu1 %v3433_v24 }
 0x1d6   :  { %v3440_v46 = vpop.xlane.xlu0 %568 }
 0x1d7   :  { %v3466_v61 = vpop.xlane.xlu1 %824  ;;  %vm570_vm12 = vcmp.eq.f32.partialorder %v3300_v36, %v3440_v46  ;;  %v3547_v36 = vsel %vm742_vm11, %v2669_v11, 4294967295 }
 0x1d8   :  { %vm826_vm5 = vcmp.eq.f32.partialorder %v3307_v50, %v3466_v61  ;;  %v905_v3 = vshra.s32 %v3547_v36, 16 }
 0x1da   :  { %880 = vmax.xlane.f32.xlu1 %v3446_v58  ;;  %v3561_v50 = vcvt.s32.f32 %v905_v3 }
 0x1de   :  { %v3454_v52 = vpop.xlane.xlu0 %708 }
 0x1df   :  { %vm710_vm13 = vcmp.eq.f32.partialorder %v3325_v6, %v3454_v52  ;;  %v3487_v30 = vpop.xlane.xlu1 %474 }
 0x1e0   :  { %v711_v41 = vsel %vm710_vm13, %v706_v32, -inf  ;;  %vm487_vm13 = vcmp.eq.f32.partialorder %v2990_v57, %v3330_v1  ;;  %v3963_v1 = vld [vmem:[#allocation10_spill] sm:$0xff]  ;;  %vm747_vm1 = vcmp.eq.f32.partialorder %v3965_v27, %v3487_v30 }
 0x1e1   :  { %712 = vmax.xlane.f32.xlu2 %v711_v41  ;;  %v933_v41 = vshra.s32 %v3502_v40, 16  ;;  %vm746_vm9 = vcmp.eq.f32.partialorder %v3964_v48, %v3963_v1  ;;  %v3587_v54 = vsel %vm747_vm1, %v2669_v11, 4294967295 }
 0x1e2   :  { %652 = vmax.xlane.f32.xlu1 %v3460_v51 }
 0x1e3   :  { %v3515_v16 = vcvt.s32.f32 %v933_v41  ;;  %v3563_v41 = vcvt.s32.f32 %v891_v7  ;;  %v519_v7 = vcvt.f32.s32 %v3402_v19  ;;  %v2336_v19 = vmov 1.0  }
 0x1e5   :  { %v520_v27 = vshll.u32 %v519_v7, 16 }
 0x1e6   :  { %v3476_v6 = vpop.xlane.xlu0 %582 }
 0x1e7   :  { %vm584_vm0 = vcmp.eq.f32.partialorder %v3336_v47, %v3476_v6  ;;  %v820_v47 = vand.u32 65535, %v3284_v5 }
 0x1e9   :  { %558 = vmax.xlane.f32.xlu2 %v557_v12  ;;  %v799_v12 = vsel %vm798_vm10, %v794_v43, -inf }
 0x1ea   :  { %950 = vmax.xlane.f32.xlu1 %v3481_v13 }
 0x1ed   :  { %v3489_v34 = vpop.xlane.xlu2 %838 }
 0x1ee   :  { %v3493_v4 = vpop.xlane.xlu0 %722  ;;  %vm840_vm14 = vcmp.eq.f32.partialorder %v3347_v28, %v3489_v34  ;;  %v592_v28 = vand.u32 65535, %v3355_v49  ;;  %v564_v49 = vand.u32 65535, %v3281_v44  ;;  %v585_v44 = vsel %vm584_vm0, %v580_v60, -inf  ;;  %v3966_v60 = vld [vmem:[#allocation11_spill] sm:$0xff] }
 0x1ef   :  { %vm724_vm6 = vcmp.eq.f32.partialorder %v3351_v14, %v3493_v4  ;;  %v841_v25 = vsel %vm840_vm14, %v836_v17, -inf }
 0x1f0   :  { %v725_v32 = vsel %vm724_vm6, %v720_v29, -inf  ;;  %v594_v53 = vcvt.s32.f32 %v592_v28  ;;  %v566_v29 = vcvt.s32.f32 %v564_v49  ;;  %v3566_v28 = vsel %vm487_vm13, %v2669_v11, 4294967295 }
 0x1f1   :  { %638 = vmax.xlane.f32.xlu2 %v3497_v37  ;;  %726 = vmax.xlane.f32.xlu0 %v725_v32  ;;  %v806_v32 = vand.u32 65535, %v3251_v38  ;;  %v822_v38 = vcvt.s32.f32 %v820_v47  ;;  %v663_v57 = vshra.s32 %v3566_v28, 16  ;;  %v3584_v49 = vsel %vm746_vm9, %v2669_v11, 4294967295 }
 0x1f2   :  { %842 = vmax.xlane.f32.xlu1 %v841_v25  ;;  %v571_v45 = vsel %vm570_vm12, %v566_v29, -inf  ;;  %v620_v29 = vand.u32 65535, %v3966_v60 }
 0x1f3   :  { %v808_v5 = vcvt.s32.f32 %v806_v32  ;;  %v827_v9 = vsel %vm826_vm5, %v822_v38, -inf  ;;  %v3969_v38 = vld [vmem:[#allocation15_spill] sm:$0xff] }
 0x1f5   :  { %v3508_v20 = vpop.xlane.xlu1 %596  ;;  %v813_v63 = vsel %vm812_vm15, %v808_v5, -inf  ;;  %v622_v5 = vcvt.s32.f32 %v620_v29 }
 0x1f6   :  { %v467_v14 = vpop.xlane.xlu0 %466  ;;  %vm598_vm8 = vcmp.eq.f32.partialorder %v3360_v31, %v3508_v20 }
 0x1f7   :  { %vm743_vm2 = vcmp.eq.f32.partialorder %v2849_v22, %v467_v14  ;;  %v599_v33 = vsel %vm598_vm8, %v594_v53, -inf  ;;  %v3569_v14 = vsel %vm488_vm3, %v2669_v11, 4294967295 }
 0x1f8   :  { %v3521_v55 = vsel %vm743_vm2, %v2669_v11, 4294967295  ;;  %v677_v43 = vshra.s32 %v3569_v14, 16 }
 0x1f9   :  { %936 = vmax.xlane.f32.xlu2 %v3515_v16  ;;  %800 = vmax.xlane.f32.xlu0 %v799_v12  ;;  %v919_v22 = vshra.s32 %v3521_v55, 16  ;;  %v3581_v12 = vcvt.s32.f32 %v663_v57 }
 0x1fa   :  { %600 = vmax.xlane.f32.xlu1 %v599_v33  ;;  %v3579_v53 = vcvt.s32.f32 %v677_v43  ;;  %v975_v33 = vshra.s32 %v3587_v54, 16  ;;  %v3970_v43 = vld [vmem:[#allocation13_spill] sm:$0xff] }
 0x1fb   :  { %v3529_v17 = vcvt.s32.f32 %v919_v22  ;;  %v961_v22 = vshra.s32 %v3584_v49, 16  ;;  %v848_v57 = vand.u32 65535, %v3970_v43 }
 0x1fd   :  { %v3595_v30 = vcvt.s32.f32 %v961_v22  ;;  %v3601_v32 = vpop.xlane.xlu1 %624  ;;  %v3971_v22 = vld [vmem:[#allocation16_spill] sm:$0xff]  ;;  %v850_v60 = vcvt.s32.f32 %v848_v57 }
 0x1fe   :  { %v439_v31 = vpop.xlane.xlu0 %438 }
 0x1ff   :  { %vm489_vm4 = vcmp.eq.f32.partialorder %v2912_v56, %v439_v31  ;;  %v3593_v31 = vcvt.s32.f32 %v975_v33 }
 0x200   :  { %v3534_v25 = vsel %vm489_vm4, %v2669_v11, 4294967295 }
 0x201   :  { %586 = vmax.xlane.f32.xlu2 %v585_v44  ;;  %572 = vmax.xlane.f32.xlu0 %v571_v45  ;;  %v691_v56 = vshra.s32 %v3534_v25, 16  ;;  %v3967_v44 = vld [vmem:[#allocation14_spill] sm:$0xff] }
 0x202   :  { %922 = vmax.xlane.f32.xlu1 %v3529_v17  ;;  %v606_v45 = vand.u32 65535, %v3967_v44 }
 0x203   :  { %v3552_v2 = vcvt.s32.f32 %v691_v56  ;;  %v3968_v56 = vld [vmem:[#allocation12_spill] sm:$0xff] }
 0x204   :  { %vm626_vm14 = vcmp.eq.f32.partialorder %v3968_v56, %v3601_v32 }
 0x205   :  { %v3603_v47 = vpop.xlane.xlu2 %610 }
 0x206   :  { %vm612_vm6 = vcmp.eq.f32.partialorder %v3969_v38, %v3603_v47  ;;  %v3611_v1 = vpop.xlane.xlu0 %852 }
 0x207   :  { %vm854_vm10 = vcmp.eq.f32.partialorder %v3971_v22, %v3611_v1 }
 0x208   :  { %v855_v29 = vsel %vm854_vm10, %v850_v60, -inf }
 0x209   :  { %828 = vmax.xlane.f32.xlu2 %v827_v9  ;;  %814 = vmax.xlane.f32.xlu0 %v813_v63  ;;  %v608_v9 = vcvt.s32.f32 %v606_v45  ;;  %v627_v63 = vsel %vm626_vm14, %v622_v5, -inf  ;;  %v533_v45 = vcvt.f32.s32 %v3412_v59 }
 0x20a   :  { %694 = vmax.xlane.f32.xlu1 %v3552_v2 }
 0x20b   :  { %v613_v3 = vsel %vm612_vm6, %v608_v9, -inf  ;;  %v534_v38 = vshll.u32 %v533_v45, 16  ;;  %v715_v45 = vcvt.f32.s32 %v3454_v52  ;;  %v729_v52 = vcvt.f32.s32 %v3493_v4 }
 0x20c   :  { %v932_v4 = vand.u32 65535, %v3502_v40 }
 0x211   :  { %908 = vmax.xlane.f32.xlu2 %v3561_v50  ;;  %894 = vmax.xlane.f32.xlu0 %v3563_v41 }
 0x219   :  { %680 = vmax.xlane.f32.xlu2 %v3579_v53  ;;  %666 = vmax.xlane.f32.xlu0 %v3581_v12 }
 0x221   :  { %978 = vmax.xlane.f32.xlu2 %v3593_v31  ;;  %964 = vmax.xlane.f32.xlu0 %v3595_v30 }
 0x229   :  { %628 = vmax.xlane.f32.xlu2 %v627_v63  ;;  %614 = vmax.xlane.f32.xlu0 %v613_v3  ;;  %v547_v3 = vcvt.f32.s32 %v3422_v62  ;;  %v876_v62 = vand.u32 65535, %v3436_v0 }
 0x22b   :  { %v548_v59 = vshll.u32 %v547_v3, 16 }
 0x22c   :  { %v517_v48 = vpop.xlane.xlu2 %516  ;;  %v3618_v9 = vpop.xlane.xlu1 %772 }
 0x22d   :  { %v518_v33 = vcvt.f32.s32 %v517_v48  ;;  %v862_v48 = vand.u32 65535, %v3427_v23 }
 0x22f   :  { %v521_v44 = vadd.s32 %v520_v27, %v518_v33  ;;  %v864_v33 = vcvt.s32.f32 %v862_v48 }
 0x231   :  { %856 = vmax.xlane.f32.xlu0 %v855_v29  ;;  %vm988_vm2 = vcmp.eq.s32.totalorder %v2669_v11, %v521_v44  ;;  %v878_v29 = vcvt.s32.f32 %v876_v62 }
 0x232   :  { %2198 = vmatmul.msk.f32.vlgmr.msra.gmra.mxu1 %vm988_vm2, %v2336_v19 }
 0x234   :  { %v531_v56 = vpop.xlane.xlu0 %530 }
 0x235   :  { %v532_v5 = vcvt.f32.s32 %v531_v56  ;;  %v3631_v60 = vpop.xlane.xlu2 %786 }
 0x237   :  { %v535_v63 = vadd.s32 %v534_v38, %v532_v5  ;;  %v716_v38 = vshll.u32 %v715_v45, 16  ;;  %v774_v45 = vcvt.f32.s32 %v3618_v9 }
 0x239   :  { %vm989_vm8 = vcmp.eq.s32.totalorder %v2669_v11, %v535_v63  ;;  %v561_v63 = vcvt.f32.s32 %v3444_v18 }
 0x23a   :  { %2199 = vmatmul.msk.f32.gmra.mxu1 %vm989_vm8, %v2336_v19 }
 0x23b   :  { %v562_v3 = vshll.u32 %v561_v63, 16  ;;  %v789_v63 = vcvt.f32.s32 %v3414_v10 }
 0x23d   :  { %v545_v7 = vpop.xlane.xlu1 %544 }
 0x23e   :  { %v546_v43 = vcvt.f32.s32 %v545_v7 }
 0x240   :  { %v549_v57 = vadd.s32 %v548_v59, %v546_v43  ;;  %v634_v43 = vand.u32 65535, %v3479_v42  ;;  %v648_v42 = vand.u32 65535, %v3450_v35 }
 0x242   :  { %vm990_vm0 = vcmp.eq.s32.totalorder %v2669_v11, %v549_v57  ;;  %v636_v48 = vcvt.s32.f32 %v634_v43 }
 0x243   :  { %2200 = vmatmul.msk.f32.gmra.mxu1 %vm990_vm0, %v2336_v19 }
 0x245   :  { %v3626_v27 = vpop.xlane.xlu1 %866 }
 0x246   :  { %vm868_vm12 = vcmp.eq.f32.partialorder %v3433_v24, %v3626_v27 }
 0x247   :  { %v869_v22 = vsel %vm868_vm12, %v864_v33, -inf  ;;  %v730_v33 = vshll.u32 %v729_v52, 16 }
 0x248   :  { %870 = vmax.xlane.f32.xlu0 %v869_v22 }
 0x24d   :  { %v3633_v44 = vpop.xlane.xlu1 %880 }
 0x24e   :  { %vm882_vm4 = vcmp.eq.f32.partialorder %v3446_v58, %v3633_v44 }
 0x24f   :  { %v883_v23 = vsel %vm882_vm4, %v878_v29, -inf  ;;  %v775_v29 = vcvt.f32.s32 %v3404_v15 }
 0x250   :  { %884 = vmax.xlane.f32.xlu2 %v883_v23 }
 0x254   :  { %v713_v56 = vpop.xlane.xlu2 %712 }
 0x255   :  { %v714_v5 = vcvt.f32.s32 %v713_v56  ;;  %v3641_v59 = vpop.xlane.xlu1 %652 }
 0x256   :  { %vm654_vm13 = vcmp.eq.f32.partialorder %v3460_v51, %v3641_v59  ;;  %v788_v51 = vcvt.f32.s32 %v3631_v60  ;;  %v589_v60 = vcvt.f32.s32 %v3476_v6  ;;  %v817_v6 = vcvt.f32.s32 %v3430_v8 }
 0x257   :  { %v717_v24 = vadd.s32 %v716_v38, %v714_v5  ;;  %v776_v38 = vshll.u32 %v775_v29, 16  ;;  %v650_v5 = vcvt.s32.f32 %v648_v42 }
 0x258   :  { %v590_v29 = vshll.u32 %v589_v60, 16  ;;  %v918_v60 = vand.u32 65535, %v3521_v55 }
 0x259   :  { %vm1002_vm11 = vcmp.eq.s32.totalorder %v2669_v11, %v717_v24  ;;  %v934_v24 = vcvt.s32.f32 %v932_v4  ;;  %v777_v35 = vadd.s32 %v776_v38, %v774_v45  ;;  %v655_v40 = vsel %vm654_vm13, %v650_v5, -inf }
 0x25a   :  { %2212 = vmatmul.msk.f32.vlgmr.msra.gmra.mxu2 %vm1002_vm11, %v2336_v19  ;;  %v603_v38 = vcvt.f32.s32 %v3508_v20 }
 0x25b   :  { %vm1036_vm9 = vcmp.eq.s32.totalorder %v2669_v11, %v777_v35  ;;  %v818_v35 = vshll.u32 %v817_v6, 16 }
 0x25c   :  { %v559_v0 = vpop.xlane.xlu2 %558 }
 0x25d   :  { %v560_v7 = vcvt.f32.s32 %v559_v0  ;;  %v3655_v56 = vpop.xlane.xlu1 %950  ;;  %v946_v0 = vand.u32 65535, %v3464_v39 }
 0x25e   :  { %vm952_vm1 = vcmp.eq.f32.partialorder %v3481_v13, %v3655_v56 }
 0x25f   :  { %v563_v58 = vadd.s32 %v562_v3, %v560_v7  ;;  %v575_v3 = vcvt.f32.s32 %v3440_v46  ;;  %v790_v7 = vshll.u32 %v789_v63, 16  ;;  %v948_v43 = vcvt.s32.f32 %v946_v0 }
 0x260   :  { %v803_v46 = vcvt.f32.s32 %v3469_v26 }
 0x261   :  { %vm991_vm7 = vcmp.eq.s32.totalorder %v2669_v11, %v563_v58  ;;  %v576_v52 = vshll.u32 %v575_v3, 16  ;;  %v831_v3 = vcvt.f32.s32 %v3466_v61 }
 0x262   :  { %2201 = vmatmul.msk.f32.gmra.mxu1 %vm991_vm7, %v2336_v19  ;;  %v804_v13 = vshll.u32 %v803_v46, 16  ;;  %v676_v46 = vand.u32 65535, %v3569_v14  ;;  %v920_v14 = vcvt.s32.f32 %v918_v60 }
 0x264   :  { %v3647_v57 = vpop.xlane.xlu2 %638  ;;  %v727_v18 = vpop.xlane.xlu0 %726 }
 0x265   :  { %v728_v22 = vcvt.f32.s32 %v727_v18  ;;  %vm640_vm5 = vcmp.eq.f32.partialorder %v3497_v37, %v3647_v57  ;;  %v3671_v58 = vpop.xlane.xlu1 %842  ;;  %v791_v18 = vadd.s32 %v790_v7, %v788_v51  ;;  %v662_v51 = vand.u32 65535, %v3566_v28 }
 0x266   :  { %v641_v62 = vsel %vm640_vm5, %v636_v48, -inf  ;;  %v953_v48 = vsel %vm952_vm1, %v948_v43, -inf  ;;  %v904_v7 = vand.u32 65535, %v3547_v36 }
 0x267   :  { %v731_v23 = vadd.s32 %v730_v33, %v728_v22  ;;  %642 = vmax.xlane.f32.xlu1 %v641_v62  ;;  %vm1037_vm6 = vcmp.eq.s32.totalorder %v2669_v11, %v791_v18  ;;  %v664_v43 = vcvt.s32.f32 %v662_v51 }
 0x268   :  { %v906_v28 = vcvt.s32.f32 %v904_v7 }
 0x269   :  { %vm1003_vm15 = vcmp.eq.s32.totalorder %v2669_v11, %v731_v23 }
 0x26a   :  { %2213 = vmatmul.msk.f32.gmra.mxu2 %vm1003_vm15, %v2336_v19 }
 0x26c   :  { %v3661_v37 = vpop.xlane.xlu2 %936  ;;  %v801_v15 = vpop.xlane.xlu0 %800 }
 0x26d   :  { %vm938_vm3 = vcmp.eq.f32.partialorder %v3515_v16, %v3661_v37  ;;  %v802_v22 = vcvt.f32.s32 %v801_v15  ;;  %v601_v45 = vpop.xlane.xlu1 %600  ;;  %v890_v15 = vand.u32 65535, %v3550_v21 }
 0x26e   :  { %v939_v9 = vsel %vm938_vm3, %v934_v24, -inf  ;;  %v602_v5 = vcvt.f32.s32 %v601_v45 }
 0x26f   :  { %656 = vmax.xlane.f32.xlu1 %v655_v40  ;;  %940 = vmax.xlane.f32.xlu0 %v939_v9  ;;  %v805_v4 = vadd.s32 %v804_v13, %v802_v22  ;;  %v604_v40 = vshll.u32 %v603_v38, 16  ;;  %v892_v8 = vcvt.s32.f32 %v890_v15  ;;  %v678_v22 = vcvt.s32.f32 %v676_v46 }
 0x271   :  { %vm1038_vm2 = vcmp.eq.s32.totalorder %v2669_v11, %v805_v4  ;;  %v605_v20 = vadd.s32 %v604_v40, %v602_v5  ;;  %v859_v5 = vcvt.f32.s32 %v3611_v1 }
 0x272   :  { %2214 = vmatmul.msk.f32.gmra.mxu2 %vm1036_vm9, %v2336_v19 }
 0x273   :  { %vm994_vm0 = vcmp.eq.s32.totalorder %v2669_v11, %v605_v20 }
 0x274   :  { %v587_v16 = vpop.xlane.xlu2 %586  ;;  %v573_v10 = vpop.xlane.xlu0 %572 }
 0x275   :  { %v574_v39 = vcvt.f32.s32 %v573_v10  ;;  %v588_v62 = vcvt.f32.s32 %v587_v16  ;;  %v832_v10 = vshll.u32 %v831_v3, 16  ;;  %v873_v3 = vcvt.f32.s32 %v3626_v27 }
 0x277   :  { %v577_v33 = vadd.s32 %v576_v52, %v574_v39  ;;  %954 = vmax.xlane.f32.xlu0 %v953_v48  ;;  %v591_v26 = vadd.s32 %v590_v29, %v588_v62  ;;  %v3709_v52 = vpop.xlane.xlu1 %922  ;;  %v845_v48 = vcvt.f32.s32 %v3489_v34  ;;  %v874_v7 = vshll.u32 %v873_v3, 16 }
 0x278   :  { %vm924_vm5 = vcmp.eq.f32.partialorder %v3529_v17, %v3709_v52  ;;  %v690_v17 = vand.u32 65535, %v3534_v25 }
 0x279   :  { %vm992_vm14 = vcmp.eq.s32.totalorder %v2669_v11, %v577_v33  ;;  %vm993_vm10 = vcmp.eq.s32.totalorder %v2669_v11, %v591_v26  ;;  %v844_v33 = vcvt.f32.s32 %v3671_v58  ;;  %v925_v58 = vsel %vm924_vm5, %v920_v14, -inf }
 0x27a   :  { %2202 = vmatmul.msk.f32.gmra.mxu1 %vm992_vm14, %v2336_v19  ;;  %2215 = vmatmul.msk.f32.gmra.mxu2 %vm1037_vm6, %v2336_v19  ;;  %v692_v4 = vcvt.s32.f32 %v690_v17  ;;  %v659_v14 = vcvt.f32.s32 %v3641_v59 }
 0x27c   :  { %v829_v23 = vpop.xlane.xlu2 %828  ;;  %v815_v42 = vpop.xlane.xlu0 %814 }
 0x27d   :  { %v816_v24 = vcvt.f32.s32 %v815_v42  ;;  %v830_v16 = vcvt.f32.s32 %v829_v23  ;;  %v617_v42 = vcvt.f32.s32 %v3603_v47 }
 0x27f   :  { %v819_v0 = vadd.s32 %v818_v35, %v816_v24  ;;  %v833_v36 = vadd.s32 %v832_v10, %v830_v16  ;;  %v3729_v23 = vpop.xlane.xlu1 %694  ;;  %v618_v25 = vshll.u32 %v617_v42, 16  ;;  %v860_v35 = vshll.u32 %v859_v5, 16 }
 0x280   :  { %vm696_vm9 = vcmp.eq.f32.partialorder %v3552_v2, %v3729_v23 }
 0x281   :  { %vm1039_vm12 = vcmp.eq.s32.totalorder %v2669_v11, %v819_v0  ;;  %vm1040_vm7 = vcmp.eq.s32.totalorder %v2669_v11, %v833_v36  ;;  %v697_v38 = vsel %vm696_vm9, %v692_v4, -inf }
 0x282   :  { %2203 = vmatmul.msk.f32.gmra.mxu1 %vm993_vm10, %v2336_v19  ;;  %2216 = vmatmul.msk.f32.gmra.mxu2 %vm1038_vm2, %v2336_v19 }
 0x284   :  { %v3688_v9 = vpop.xlane.xlu2 %908  ;;  %v3690_v63 = vpop.xlane.xlu0 %894 }
 0x285   :  { %vm896_vm8 = vcmp.eq.f32.partialorder %v3563_v41, %v3690_v63  ;;  %vm910_vm4 = vcmp.eq.f32.partialorder %v3561_v50, %v3688_v9  ;;  %v960_v50 = vand.u32 65535, %v3584_v49 }
 0x286   :  { %v897_v21 = vsel %vm896_vm8, %v892_v8, -inf  ;;  %v911_v18 = vsel %vm910_vm4, %v906_v28, -inf  ;;  %v887_v28 = vcvt.f32.s32 %v3633_v44  ;;  %v645_v44 = vcvt.f32.s32 %v3647_v57 }
 0x287   :  { %898 = vmax.xlane.f32.xlu2 %v897_v21  ;;  %v962_v55 = vcvt.s32.f32 %v960_v50 }
 0x288   :  { %v646_v46 = vshll.u32 %v645_v44, 16 }
 0x28a   :  { %2204 = vmatmul.msk.f32.gmra.mxu1 %vm994_vm0, %v2336_v19  ;;  %2217 = vmatmul.msk.f32.gmra.mxu2 %vm1039_vm12, %v2336_v19 }
 0x28c   :  { %v3703_v41 = vpop.xlane.xlu2 %680  ;;  %v3705_v61 = vpop.xlane.xlu0 %666 }
 0x28d   :  { %vm668_vm11 = vcmp.eq.f32.partialorder %v3581_v12, %v3705_v61  ;;  %v846_v12 = vshll.u32 %v845_v48, 16  ;;  %vm682_vm15 = vcmp.eq.f32.partialorder %v3579_v53, %v3703_v41  ;;  %v974_v53 = vand.u32 65535, %v3587_v54 }
 0x28e   :  { %v669_v39 = vsel %vm668_vm11, %v664_v43, -inf  ;;  %v683_v13 = vsel %vm682_vm15, %v678_v22, -inf  ;;  %v631_v54 = vcvt.f32.s32 %v3601_v32  ;;  %v943_v22 = vcvt.f32.s32 %v3661_v37 }
 0x28f   :  { %912 = vmax.xlane.f32.xlu2 %v911_v18  ;;  %670 = vmax.xlane.f32.xlu1 %v669_v39  ;;  %v847_v62 = vadd.s32 %v846_v12, %v844_v33  ;;  %v976_v45 = vcvt.s32.f32 %v974_v53  ;;  %v888_v39 = vshll.u32 %v887_v28, 16  ;;  %v687_v28 = vcvt.f32.s32 %v3703_v41 }
 0x290   :  { %v632_v2 = vshll.u32 %v631_v54, 16 }
 0x291   :  { %vm1041_vm3 = vcmp.eq.s32.totalorder %v2669_v11, %v847_v62 }
 0x292   :  { %2218 = vmatmul.msk.f32.gmra.mxu2 %vm1040_vm7, %v2336_v19 }
 0x294   :  { %v3722_v34 = vpop.xlane.xlu2 %978  ;;  %v3724_v49 = vpop.xlane.xlu0 %964 }
 0x295   :  { %vm966_vm13 = vcmp.eq.f32.partialorder %v3595_v30, %v3724_v49  ;;  %vm980_vm1 = vcmp.eq.f32.partialorder %v3593_v31, %v3722_v34 }
 0x296   :  { %v967_v29 = vsel %vm966_vm13, %v962_v55, -inf  ;;  %v981_v15 = vsel %vm980_vm1, %v976_v45, -inf }
 0x297   :  { %926 = vmax.xlane.f32.xlu2 %v925_v58  ;;  %684 = vmax.xlane.f32.xlu1 %v683_v13  ;;  %v660_v13 = vshll.u32 %v659_v14, 16 }
 0x298   :  { %968 = vmax.xlane.f32.xlu0 %v967_v29  ;;  %v944_v29 = vshll.u32 %v943_v22, 16  ;;  %v701_v22 = vcvt.f32.s32 %v3729_v23 }
 0x29a   :  { %2219 = vmatmul.msk.f32.gmra.mxu2 %vm1041_vm3, %v2336_v19 }
 0x29c   :  { %v615_v30 = vpop.xlane.xlu0 %614  ;;  %v629_v6 = vpop.xlane.xlu2 %628 }
 0x29d   :  { %v616_v26 = vcvt.f32.s32 %v615_v30  ;;  %v630_v24 = vcvt.f32.s32 %v629_v6  ;;  %v957_v30 = vcvt.f32.s32 %v3655_v56  ;;  %v901_v56 = vcvt.f32.s32 %v3690_v63 }
 0x29f   :  { %v619_v47 = vadd.s32 %v618_v25, %v616_v26  ;;  %698 = vmax.xlane.f32.xlu1 %v697_v38  ;;  %v633_v40 = vadd.s32 %v632_v2, %v630_v24  ;;  %v958_v37 = vshll.u32 %v957_v30, 16 }
 0x2a0   :  { %982 = vmax.xlane.f32.xlu0 %v981_v15 }
 0x2a1   :  { %vm995_vm14 = vcmp.eq.s32.totalorder %v2669_v11, %v619_v47  ;;  %vm996_vm6 = vcmp.eq.s32.totalorder %v2669_v11, %v633_v40  ;;  %v902_v47 = vshll.u32 %v901_v56, 16  ;;  %v673_v40 = vcvt.f32.s32 %v3705_v61 }
 0x2a2   :  { %2205 = vmatmul.msk.f32.gmra.mxu1 %vm995_vm14, %v2336_v19  ;;  %v929_v61 = vcvt.f32.s32 %v3709_v52 }
 0x2a4   :  { %v857_v31 = vpop.xlane.xlu0 %856 }
 0x2a5   :  { %v858_v8 = vcvt.f32.s32 %v857_v31 }
 0x2a7   :  { %v861_v20 = vadd.s32 %v860_v35, %v858_v8  ;;  %v915_v35 = vcvt.f32.s32 %v3688_v9 }
 0x2a9   :  { %vm1042_vm10 = vcmp.eq.s32.totalorder %v2669_v11, %v861_v20 }
 0x2aa   :  { %2206 = vmatmul.msk.f32.gmra.mxu1 %vm996_vm6, %v2336_v19  ;;  %2220 = vmatmul.msk.f32.gmra.mxu2 %vm1042_vm10, %v2336_v19  ;;  %vm2144_vm6 = vcmask 15368  }
 0x2af   :  { %v3747_v32 = vpop.f32.mrf.mxu1 }
 0x2b0   :  { %v1197_v1 = vmul.f32 %v3747_v32, %v3747_v32 }
 0x2b2   :  { %1213 = vadd.xlane.f32.xlu2 %v1197_v1  ;;  %v916_v1 = vshll.u32 %v915_v35, 16 }
 0x2b7   :  { %v3751_v0 = vpop.f32.mrf.mxu1 }
 0x2b8   :  { %v1198_v21 = vmul.f32 %v3751_v0, %v3751_v0 }
 0x2ba   :  { %1215 = vadd.xlane.f32.xlu0 %v1198_v21  ;;  %v674_v21 = vshll.u32 %v673_v40, 16 }
 0x2bb   :  { %v871_v51 = vpop.xlane.xlu0 %870 }
 0x2bc   :  { %v872_v16 = vcvt.f32.s32 %v871_v51 }
 0x2be   :  { %v875_v10 = vadd.s32 %v874_v7, %v872_v16 }
 0x2c0   :  { %v3757_v43 = vpop.f32.mrf.mxu1  ;;  %vm1043_vm2 = vcmp.eq.s32.totalorder %v2669_v11, %v875_v10 }
 0x2c1   :  { %2221 = vmatmul.msk.f32.gmra.mxu2 %vm1043_vm2, %v2336_v19  ;;  %v1199_v36 = vmul.f32 %v3757_v43, %v3757_v43 }
 0x2c3   :  { %v885_v18 = vpop.xlane.xlu2 %884  ;;  %1217 = vadd.xlane.f32.xlu1 %v1199_v36 }
 0x2c4   :  { %v886_v27 = vcvt.f32.s32 %v885_v18  ;;  %v971_v18 = vcvt.f32.s32 %v3724_v49 }
 0x2c6   :  { %v889_v48 = vadd.s32 %v888_v39, %v886_v27 }
 0x2c8   :  { %vm1044_vm8 = vcmp.eq.s32.totalorder %v2669_v11, %v889_v48  ;;  %v688_v48 = vshll.u32 %v687_v28, 16 }
 0x2c9   :  { %2222 = vmatmul.msk.f32.gmra.mxu2 %vm1044_vm8, %v2336_v19 }
 0x2da   :  { %v643_v50 = vpop.xlane.xlu1 %642 }
 0x2db   :  { %v644_v60 = vcvt.f32.s32 %v643_v50  ;;  %v972_v50 = vshll.u32 %v971_v18, 16 }
 0x2dd   :  { %v647_v33 = vadd.s32 %v646_v46, %v644_v60  ;;  %v1143_v12 = vpop.f32.mrf.mxu2 }
 0x2df   :  { %v1110_v55 = vpop.f32.mrf.mxu1  ;;  %vm997_vm0 = vcmp.eq.s32.totalorder %v2669_v11, %v647_v33 }
 0x2e0   :  { %2207 = vmatmul.msk.f32.gmra.mxu1 %vm997_vm0, %v2336_v19  ;;  %v985_v55 = vcvt.f32.s32 %v3722_v34 }
 0x2e2   :  { %v657_v62 = vpop.xlane.xlu1 %656  ;;  %v941_v58 = vpop.xlane.xlu0 %940  ;;  %v986_v23 = vshll.u32 %v985_v55, 16 }
 0x2e3   :  { %v658_v17 = vcvt.f32.s32 %v657_v62  ;;  %v942_v57 = vcvt.f32.s32 %v941_v58  ;;  %v702_v58 = vshll.u32 %v701_v22, 16 }
 0x2e5   :  { %v661_v53 = vadd.s32 %v660_v13, %v658_v17  ;;  %v945_v42 = vadd.s32 %v944_v29, %v942_v57 }
 0x2e7   :  { %vm998_vm12 = vcmp.eq.s32.totalorder %v2669_v11, %v661_v53  ;;  %vm1048_vm4 = vcmp.eq.s32.totalorder %v2669_v11, %v945_v42 }
 0x2e8   :  { %2208 = vmatmul.msk.f32.gmra.mxu1 %vm998_vm12, %v2336_v19  ;;  %2226 = vmatmul.msk.f32.vlgmr.msrb.gmra.mxu3 %vm1048_vm4, %v2336_v19 }
 0x2ea   :  { %v955_v59 = vpop.xlane.xlu0 %954 }
 0x2eb   :  { %v956_v4 = vcvt.f32.s32 %v955_v59 }
 0x2ed   :  { %v959_v25 = vadd.s32 %v958_v37, %v956_v4  ;;  %v1146_v26 = vpop.f32.mrf.mxu2 }
 0x2ef   :  { %vm1049_vm11 = vcmp.eq.s32.totalorder %v2669_v11, %v959_v25  ;;  %v3972_v25 = vmov 0.0  }
 0x2f0   :  { %2227 = vmatmul.msk.f32.gmra.mxu3 %vm1049_vm11, %v2336_v19  ;;  %2148 = vst.msk [vmem:[%s3888_s4 + $0x18] sm:$0xff] %vm2144_vm6, %v3972_v25 }
 0x2f1   :  { %2149 = vst.msk [vmem:[%s3888_s4 + $0x20] sm:$0xff] %vm2144_vm6, %v3972_v25 }
 0x2f2   :  { %2150 = vst.msk [vmem:[%s3888_s4 + $0x28] sm:$0xff] %vm2144_vm6, %v3972_v25 }
 0x2f3   :  { %2151 = vst.msk [vmem:[%s3888_s4 + $0x30] sm:$0xff] %vm2144_vm6, %v3972_v25 }
 0x2f4   :  { %2152 = vst.msk [vmem:[%s3888_s4 + $0x38] sm:$0xff] %vm2144_vm6, %v3972_v25 }
 0x2f5   :  { %v1149_v45 = vpop.f32.mrf.mxu2  ;;  %2153 = vst.msk [vmem:[%s3888_s4 + $0x40] sm:$0xff] %vm2144_vm6, %v3972_v25 }
 0x2f6   :  { %v1245_v6 = vmul.f32 %v1149_v45, %v1149_v45  ;;  %v1293_v2 = vmul.f32 %v1149_v45, %v3747_v32  ;;  %2154 = vst.msk [vmem:[%s3888_s4 + $0x48] sm:$0xff] %vm2144_vm6, %v3972_v25 }
 0x2f7   :  { %v1113_v38 = vpop.f32.mrf.mxu1  ;;  %2155 = vst.msk [vmem:[%s3888_s4 + $0x50] sm:$0xff] %vm2144_vm6, %v3972_v25 }
 0x2f8   :  { %1261 = vadd.xlane.f32.xlu2 %v1245_v6  ;;  %2156 = vst.msk [vmem:[%s3888_s4 + $0x58] sm:$0xff] %vm2144_vm6, %v3972_v25 }
 0x2f9   :  { %2157 = vst.msk [vmem:[%s3888_s4 + $0x60] sm:$0xff] %vm2144_vm6, %v3972_v25 }
 0x2fa   :  { %v899_v54 = vpop.xlane.xlu2 %898  ;;  %2158 = vst.msk [vmem:[%s3888_s4 + $0x68] sm:$0xff] %vm2144_vm6, %v3972_v25 }
 0x2fb   :  { %v900_v15 = vcvt.f32.s32 %v899_v54  ;;  %2159 = vst.msk [vmem:[%s3888_s4 + $0x70] sm:$0xff] %vm2144_vm6, %v3972_v25 }
 0x2fc   :  { %2160 = vst.msk [vmem:[%s3888_s4 + $0x78] sm:$0xff] %vm2144_vm6, %v3972_v25 }
 0x2fd   :  { %v903_v5 = vadd.s32 %v902_v47, %v900_v15  ;;  %v1152_v24 = vpop.f32.mrf.mxu2 }
 0x2fe   :  { %v1246_v31 = vmul.f32 %v1152_v24, %v1152_v24  ;;  %v1294_v9 = vmul.f32 %v1152_v24, %v3751_v0  ;;  %v930_v0 = vshll.u32 %v929_v61, 16 }
 0x2ff   :  { %v1116_v8 = vpop.f32.mrf.mxu1  ;;  %vm1045_vm7 = vcmp.eq.s32.totalorder %v2669_v11, %v903_v5 }
 0x300   :  { %1309 = vadd.xlane.f32.xlu2 %v1293_v2  ;;  %1263 = vadd.xlane.f32.xlu0 %v1246_v31 }
 0x301   :  { %2223 = vmatmul.msk.f32.gmra.mxu2 %vm1045_vm7, %v2336_v19 }
 0x302   :  { %v913_v63 = vpop.xlane.xlu2 %912  ;;  %v671_v20 = vpop.xlane.xlu1 %670 }
 0x303   :  { %v914_v3 = vcvt.f32.s32 %v913_v63  ;;  %v672_v51 = vcvt.f32.s32 %v671_v20 }
 0x305   :  { %v917_v7 = vadd.s32 %v916_v1, %v914_v3  ;;  %v675_v32 = vadd.s32 %v674_v21, %v672_v51  ;;  %v1155_v16 = vpop.f32.mrf.mxu2 }
 0x306   :  { %v1247_v10 = vmul.f32 %v1155_v16, %v1155_v16  ;;  %v1295_v49 = vmul.f32 %v1155_v16, %v3757_v43 }
 0x307   :  { %v1119_v36 = vpop.f32.mrf.mxu1  ;;  %vm999_vm5 = vcmp.eq.s32.totalorder %v2669_v11, %v675_v32  ;;  %vm1046_vm15 = vcmp.eq.s32.totalorder %v2669_v11, %v917_v7 }
 0x308   :  { %1265 = vadd.xlane.f32.xlu1 %v1247_v10  ;;  %1311 = vadd.xlane.f32.xlu0 %v1294_v9 }
 0x309   :  { %2209 = vmatmul.msk.f32.gmra.mxu1 %vm999_vm5, %v2336_v19  ;;  %2224 = vmatmul.msk.f32.gmra.mxu2 %vm1046_vm15, %v2336_v19 }
 0x30a   :  { %v927_v39 = vpop.xlane.xlu2 %926  ;;  %v685_v27 = vpop.xlane.xlu1 %684 }
 0x30b   :  { %v928_v52 = vcvt.f32.s32 %v927_v39  ;;  %v686_v44 = vcvt.f32.s32 %v685_v27  ;;  %v969_v41 = vpop.xlane.xlu0 %968 }
 0x30c   :  { %v970_v46 = vcvt.f32.s32 %v969_v41 }
 0x30d   :  { %v931_v60 = vadd.s32 %v930_v0, %v928_v52  ;;  %v689_v33 = vadd.s32 %v688_v48, %v686_v44  ;;  %v1158_v12 = vpop.f32.mrf.mxu2 }
 0x30e   :  { %v973_v14 = vadd.s32 %v972_v50, %v970_v46  ;;  %v3973_v12 = vld [vmem:[#allocation7_spill] sm:$0xff] }
 0x30f   :  { %vm1000_vm13 = vcmp.eq.s32.totalorder %v2669_v11, %v689_v33  ;;  %vm1047_vm3 = vcmp.eq.s32.totalorder %v2669_v11, %v931_v60 }
 0x310   :  { %1313 = vadd.xlane.f32.xlu1 %v1295_v49  ;;  %vm1050_vm9 = vcmp.eq.s32.totalorder %v2669_v11, %v973_v14 }
 0x311   :  { %2210 = vmatmul.msk.f32.gmra.mxu1 %vm1000_vm13, %v2336_v19  ;;  %2225 = vmatmul.msk.f32.gmra.mxu2 %vm1047_vm3, %v2336_v19 }
 0x312   :  { %2228 = vmatmul.msk.f32.gmra.mxu3 %vm1050_vm9, %v2336_v19  ;;  %v699_v62 = vpop.xlane.xlu1 %698 }
 0x313   :  { %v700_v43 = vcvt.f32.s32 %v699_v62  ;;  %v983_v13 = vpop.xlane.xlu0 %982 }
 0x314   :  { %v984_v29 = vcvt.f32.s32 %v983_v13 }
 0x315   :  { %v703_v17 = vadd.s32 %v702_v58, %v700_v43  ;;  %v1161_v57 = vpop.f32.mrf.mxu2 }
 0x316   :  { %v987_v53 = vadd.s32 %v986_v23, %v984_v29 }
 0x317   :  { %vm1001_vm1 = vcmp.eq.s32.totalorder %v2669_v11, %v703_v17 }
 0x318   :  { %vm1051_vm14 = vcmp.eq.s32.totalorder %v2669_v11, %v987_v53 }
 0x319   :  { %2211 = vmatmul.msk.f32.gmra.mxu1 %vm1001_vm1, %v2336_v19 }
 0x31a   :  { %2229 = vmatmul.msk.f32.gmra.mxu3 %vm1051_vm14, %v2336_v19 }
 0x31d   :  { %v1164_v34 = vpop.f32.mrf.mxu2 }
 0x31f   :  { %v1122_v42 = vpop.f32.mrf.mxu1 }
 0x325   :  { %v1214_v19 = vpop.xlane.xlu2 %1213 }
 0x327   :  { %v1125_v30 = vpop.f32.mrf.mxu1 }
 0x32d   :  { %v1167_v59 = vpop.f32.mrf.mxu2  ;;  %v1216_v56 = vpop.xlane.xlu0 %1215 }
 0x32e   :  { %v3974_v59 = vld [vmem:[#allocation8_spill] sm:$0xff] }
 0x336   :  { %v1218_v38 = vpop.xlane.xlu1 %1217 }
 0x344   :  { %v1170_v37 = vpop.f32.mrf.mxu2 }
 0x34c   :  { %v1173_v4 = vpop.f32.mrf.mxu2 }
 0x35d   :  { %v1128_v11 = vpop.f32.mrf.mxu1 }
 0x365   :  { %v1131_v26 = vpop.f32.mrf.mxu1 }
 0x36b   :  { %v1262_v45 = vpop.xlane.xlu2 %1261  ;;  %v1185_v6 = vpop.f32.mrf.mxu3 }
 0x36c   :  { %v1341_v15 = vadd.f32 %v1262_v45, %v1214_v19 }
 0x373   :  { %v1310_v54 = vpop.xlane.xlu2 %1309  ;;  %v1188_v47 = vpop.f32.mrf.mxu3 }
 0x374   :  { %v1357_v5 = vmul.f32 2.0, %v1310_v54  ;;  %v1264_v24 = vpop.xlane.xlu0 %1263 }
 0x375   :  { %v1342_v8 = vadd.f32 %v1264_v24, %v1216_v56  ;;  %v3975_v56 = vld [vmem:[#allocation9_spill] sm:$0xff] }
 0x376   :  { %v1373_v2 = vsub.f32 %v1341_v15, %v1357_v5 }
 0x378   :  { %v1389_v31 = vmax.f32 %v1373_v2, 1e-12 }
 0x37a   :  { %2300 = vrsqrt.f32 %v1389_v31  ;;  %vm1796_vm10 = vcmp.eq.f32.partialorder %v1389_v31, inf  ;;  %v1799_v52 = vand.u32 2147483648, %v1389_v31  ;;  %vm1798_vm2 = vcmp.eq.f32.partialorder %v1389_v31, 0.0 }
 0x37b   :  { %v1266_v35 = vpop.xlane.xlu1 %1265 }
 0x37c   :  { %v1312_v40 = vpop.xlane.xlu0 %1311  ;;  %v1343_v32 = vadd.f32 %v1266_v35, %v1218_v38 }
 0x37d   :  { %v1358_v63 = vmul.f32 2.0, %v1312_v40 }
 0x37f   :  { %v1374_v20 = vsub.f32 %v1342_v8, %v1358_v63 }
 0x380   :  { %v2301_v1 = vpop.eup %2300 }
 0x381   :  { %v1790_v21 = vmul.f32 %v2301_v1, %v1389_v31  ;;  %v1390_v3 = vmax.f32 %v1374_v20, 1e-12 }
 0x383   :  { %v1791_v51 = vmul.f32 %v2301_v1, %v1790_v21  ;;  %2302 = vrsqrt.f32 %v1390_v3  ;;  %v1314_v7 = vpop.xlane.xlu1 %1313  ;;  %vm1808_vm8 = vcmp.eq.f32.partialorder %v1390_v3, inf  ;;  %v1811_v29 = vand.u32 2147483648, %v1390_v3 }
 0x384   :  { %v1359_v16 = vmul.f32 2.0, %v1314_v7  ;;  %v1176_v10 = vpop.f32.mrf.mxu2  ;;  %vm1810_vm0 = vcmp.eq.f32.partialorder %v1390_v3, 0.0 }
 0x385   :  { %v1792_v9 = vmul.f32 0.5, %v1791_v51 }
 0x386   :  { %v1375_v61 = vsub.f32 %v1343_v32, %v1359_v16  ;;  %v1134_v28 = vpop.f32.mrf.mxu1 }
 0x387   :  { %v1793_v36 = vsub.f32 1.5, %v1792_v9 }
 0x388   :  { %v1391_v18 = vmax.f32 %v1375_v61, 1e-12 }
 0x389   :  { %v2303_v39 = vpop.eup %2302  ;;  %v1794_v27 = vmul.f32 %v2301_v1, %v1793_v36 }
 0x38a   :  { %v1802_v0 = vmul.f32 %v2303_v39, %v1390_v3  ;;  %2304 = vrsqrt.f32 %v1391_v18  ;;  %vm1820_vm12 = vcmp.eq.f32.partialorder %v1391_v18, inf  ;;  %v1823_v19 = vand.u32 2147483648, %v1391_v18 }
 0x38b   :  { %v1795_v48 = vmul.f32 %v1794_v27, %v1389_v31  ;;  %vm1822_vm4 = vcmp.eq.f32.partialorder %v1391_v18, 0.0 }
 0x38c   :  { %v1803_v44 = vmul.f32 %v2303_v39, %v1802_v0  ;;  %v1179_v41 = vpop.f32.mrf.mxu2 }
 0x38d   :  { %v1797_v50 = vsel %vm1796_vm10, %v1389_v31, %v1795_v48 }
 0x38e   :  { %v1800_v46 = vsel %vm1798_vm2, %v1799_v52, %v1797_v50  ;;  %v1804_v60 = vmul.f32 0.5, %v1803_v44  ;;  %v1137_v33 = vpop.f32.mrf.mxu1 }
 0x38f   :  { %v2013_v14 = vsub.f32 %v3973_v12, %v1800_v46 }
 0x390   :  { %v2305_v49 = vpop.eup %2304  ;;  %v1805_v22 = vsub.f32 1.5, %v1804_v60 }
 0x391   :  { %v2029_v55 = vand.u32 2147483647, %v2013_v14  ;;  %v1814_v62 = vmul.f32 %v2305_v49, %v1391_v18 }
 0x392   :  { %v1806_v58 = vmul.f32 %v2303_v39, %v1805_v22 }
 0x393   :  { %2145 = vst.msk [vmem:[%s3888_s4] sm:$0xff] %vm2144_vm6, %v2029_v55  ;;  %v1815_v43 = vmul.f32 %v2305_v49, %v1814_v62 }
 0x394   :  { %v1807_v13 = vmul.f32 %v1806_v58, %v1390_v3  ;;  %v1182_v23 = vpop.f32.mrf.mxu2 }
 0x395   :  { %v1816_v17 = vmul.f32 0.5, %v1815_v43  ;;  %v1191_v57 = vpop.f32.mrf.mxu3 }
 0x396   :  { %v1809_v53 = vsel %vm1808_vm8, %v1390_v3, %v1807_v13  ;;  %v1140_v34 = vpop.f32.mrf.mxu1 }
 0x397   :  { %v1812_v42 = vsel %vm1810_vm0, %v1811_v29, %v1809_v53  ;;  %v1817_v30 = vsub.f32 1.5, %v1816_v17 }
 0x398   :  { %v2014_v37 = vsub.f32 %v3974_v59, %v1812_v42 }
 0x399   :  { %v1818_v4 = vmul.f32 %v2305_v49, %v1817_v30 }
 0x39a   :  { %v2030_v25 = vand.u32 2147483647, %v2014_v37 }
 0x39b   :  { %v1819_v11 = vmul.f32 %v1818_v4, %v1391_v18 }
 0x39c   :  { %2146 = vst.msk [vmem:[%s3888_s4 + $0x8] sm:$0xff] %vm2144_vm6, %v2030_v25 }
 0x39d   :  { %v1821_v26 = vsel %vm1820_vm12, %v1391_v18, %v1819_v11  ;;  %v1194_v45 = vpop.f32.mrf.mxu3 }
 0x39e   :  { %v1824_v6 = vsel %vm1822_vm4, %v1823_v19, %v1821_v26 }
 0x39f   :  { %v2015_v38 = vsub.f32 %v3975_v56, %v1824_v6 }
 0x3a1   :  { %v2031_v54 = vand.u32 2147483647, %v2015_v38 }
 0x3a3   :  { %2147 = vst.msk [vmem:[%s3888_s4 + $0x10] sm:$0xff] %vm2144_vm6, %v2031_v54 }
 0x3a4   :  { %2165 = vsyncpa [#allocation3], 1 }

</bundles_post_ra>
